<compile_context>
chip_gen: v6e
topology: v6e:2x2x1
jax: 0.10.0
libtpu: 0.0.40
codegen_flags: <defaults>
</compile_context>

<pallas_src>
import functools

import numpy as np
import jax
import jax.numpy as jnp
from jax.experimental import pallas as pl
from jax.experimental.pallas import tpu as pltpu


def _round_up(x, m):
    return ((x + m - 1) // m) * m


def _cnn_layer_kernel(x_ref, w_ref, b_ref, mask_ref, o_ref, acc_ref, mx_ref, *,
                      Tc, n_chunks, tap_widths, first_masked_chunk):
    """Fused multi-branch Conv1d + max-over-time + ReLU for one batch tile.

    x_ref:    (L_pad, TB, D_pad)      bf16  time-major activations
    w_ref:    (K, D_pad, F_out)       bf16  fused / zero-padded conv weights (K = max fs)
    b_ref:    (1, F_out)              f32   fused conv bias
    mask_ref: (L_out_pad, 1, F_out)   f32   0 / -1e30 validity mask (per branch, per row)
    o_ref:    (TB, F_out)             f32   relu(max_t conv)
    acc_ref:  (Tc*TB, F_out)          f32   per-chunk conv accumulator (VMEM scratch)
    mx_ref:   (TB, F_out)             f32   running max over time (VMEM scratch)
    """
    K, D, F = w_ref.shape
    TB = o_ref.shape[0]

    for c in range(n_chunks):                          # static unroll over time chunks
        t0 = c * Tc
        # Tap-wise matmuls for this chunk, accumulated in VMEM (`+=` lets Mosaic keep the
        # accumulation in the MXU result buffer on v7x).  The tap shift is a free slice on
        # the untiled leading dim; the reshape only merges leading dims (TB % 16 == 0).
        for k in range(K):                             # static unroll over taps
            Nk = tap_widths[k]                         # branches with fs > k only
            xs = x_ref[t0 + k:t0 + k + Tc, :, :].reshape(Tc * TB, D)        # bf16
            y = jnp.dot(xs, w_ref[k, :, :Nk], preferred_element_type=jnp.float32)
            if k == 0:                                 # tap 0 covers every branch (Nk == F)
                acc_ref[...] = y
            else:
                acc_ref[:, :Nk] += y

        a = acc_ref[...].reshape(Tc, TB, F)
        if c >= first_masked_chunk:                    # only tail chunks have invalid rows
            a = a + mask_ref[t0:t0 + Tc]               # (Tc, 1, F) additive -1e30 mask
        cmax = jnp.max(a, axis=0)                      # max over this chunk -> (TB, F)
        if c == 0:
            mx_ref[...] = cmax
        else:
            mx_ref[...] = jnp.maximum(mx_ref[...], cmax)

    # Bias is constant over time, so relu(max(conv) + b) == relu(max(conv + b)).
    o_ref[...] = jnp.maximum(mx_ref[...] + b_ref[...], 0.0).astype(o_ref.dtype)


def cnn_layer_forward(x, conv_weights, conv_biases, filter_sizes=(3, 4, 5)):
    """Pallas forward of CNN_Layer.

    x:            (B, d_model, L) f32  -- the NCL layout nn.Conv1d consumes.
    conv_weights: list of (nf_i, d_model, fs_i) f32 (PyTorch Conv1d weight layout)
    conv_biases:  list of (nf_i,) f32
    Returns:      list of (B, nf_i) f32, one per filter size (like the module).
    """
    filter_sizes = tuple(int(f) for f in filter_sizes)
    B, D, L = x.shape
    K = max(filter_sizes)
    fs_min = min(filter_sizes)
    assert L >= K, "sequence length must be >= largest filter size"

    nb = len(filter_sizes)
    nfs = [int(w.shape[0]) for w in conv_weights]

    # Fused column layout in DESCENDING filter-size order so branches that use tap k form a
    # contiguous prefix of the fused filter axis -> per-tap matmul width can be trimmed.
    order = sorted(range(nb), key=lambda i: -filter_sizes[i])
    col_off = [0] * nb
    off = 0
    for i in order:
        col_off[i] = off
        off += nfs[i]
    F_total = off

    D_pad = _round_up(D, 128)            # contraction dim (lanes of x, sublanes of w)
    F_out = _round_up(F_total, 128)      # fused filter dim (lanes of the output)

    Tc = 8                               # output positions per time chunk
    L_out = L - fs_min + 1               # output positions of the shortest filter
    L_out_pad = _round_up(L_out, Tc)
    n_chunks = L_out_pad // Tc
    L_pad = L_out_pad + K - 1            # x rows the largest filter needs for all chunks

    # Per-tap matmul width: only branches with fs > k use tap k; round to a lane multiple.
    tap_widths = []
    for k in range(K):
        raw = sum(nf for nf, fs in zip(nfs, filter_sizes) if fs > k)
        tap_widths.append(min(F_out, max(128, _round_up(raw, 128))))
    assert tap_widths[0] == F_out        # tap 0 covers every branch

    # First chunk that contains rows invalid for some branch (or padded rows): static.
    min_valid = L - K + 1
    first_masked_chunk = min(min_valid // Tc, n_chunks)

    # ---- batch tile selection -------------------------------------------------------
    # Multiple of 16 (bf16 sublane packing); minimize padded-batch waste first, then keep
    # >=2 grid steps (so v7x megacore shards the "parallel" axis), then prefer the fattest
    # tile (amortizes ~0.35 us/step on v5e/v6e).  Working set stays under ~14 MiB so the
    # v5e 16 MiB scoped-VMEM default is never exceeded (no vmem_limit_bytes needed).
    budget = 14 << 20
    B16 = _round_up(B, 16)
    best = None
    for tb in range(16, min(256, B16) + 1, 16):
        b_pad = _round_up(B, tb)
        steps = b_pad // tb
        vmem = (2 * L_pad * tb * D_pad * 2          # x tile, bf16, double-buffered
                + 2 * tb * F_out * 4                # output tile, f32, double-buffered
                + Tc * tb * F_out * 4               # acc scratch
                + tb * F_out * 4                    # running-max scratch
                + 2 * K * D_pad * F_out * 2         # fused weights (worst case 2 buffers)
                + 2 * L_out_pad * F_out * 4         # mask
                + 2 * F_out * 4)                    # bias
        if vmem > budget:
            continue
        key = (b_pad - B, 0 if steps >= 2 else 1, -tb)
        if best is None or key < best[0]:
            best = (key, tb)
    TB = best[1] if best is not None else 16
    B_pad = _round_up(B, TB)

    # ---- host-side layout plumbing (XLA may fuse the x relayout into the kernel) -----
    x_t = jnp.transpose(x, (2, 0, 1))                                     # (L, B, D)
    x_t = jnp.pad(x_t, ((0, L_pad - L), (0, B_pad - B), (0, D_pad - D)))
    x_t = x_t.astype(jnp.bfloat16)

    # Fuse the filter banks into one zero-padded (K, D_pad, F_out) weight + (1,F_out) bias.
    w_fused = jnp.zeros((K, D_pad, F_out), jnp.float32)
    b_fused = jnp.zeros((1, F_out), jnp.float32)
    for i in range(nb):
        fs, nf, o = filter_sizes[i], nfs[i], col_off[i]
        w_t = jnp.transpose(conv_weights[i], (2, 1, 0)).astype(jnp.float32)   # (fs, D, nf)
        w_fused = w_fused.at[:fs, :D, o:o + nf].set(w_t)
        b_fused = b_fused.at[0, o:o + nf].set(conv_biases[i].astype(jnp.float32))
    w_fused = w_fused.astype(jnp.bfloat16)

    # Additive validity mask (host constant): branch with filter size fs has only
    # L - fs + 1 valid output positions; padded time rows are invalid for every column.
    valid_len = np.full((F_out,), L_out, np.int32)
    for i in range(nb):
        valid_len[col_off[i]:col_off[i] + nfs[i]] = L - filter_sizes[i] + 1
    t_idx = np.arange(L_out_pad, dtype=np.int32)[:, None, None]
    mask = np.where(t_idx < valid_len[None, None, :], 0.0, -1e30).astype(np.float32)
    mask = jnp.asarray(mask)                                              # (L_out_pad,1,F_out)

    kernel = functools.partial(
        _cnn_layer_kernel, Tc=Tc, n_chunks=n_chunks,
        tap_widths=tuple(tap_widths), first_masked_chunk=first_masked_chunk)

    out = pl.pallas_call(
        kernel,
        out_shape=jax.ShapeDtypeStruct((B_pad, F_out), jnp.float32),
        grid=(B_pad // TB,),
        in_specs=[
            pl.BlockSpec((L_pad, TB, D_pad), lambda i: (0, i, 0)),    # batch-tiled x
            pl.BlockSpec((K, D_pad, F_out), lambda i: (0, 0, 0)),     # resident weights
            pl.BlockSpec((1, F_out), lambda i: (0, 0)),               # resident bias
            pl.BlockSpec((L_out_pad, 1, F_out), lambda i: (0, 0, 0)), # resident mask
        ],
        out_specs=pl.BlockSpec((TB, F_out), lambda i: (i, 0)),        # lane-dense output
        scratch_shapes=[
            pltpu.VMEM((Tc * TB, F_out), jnp.float32),                # per-chunk accumulator
            pltpu.VMEM((TB, F_out), jnp.float32),                     # running max over time
        ],
        compiler_params=pltpu.CompilerParams(
            dimension_semantics=("parallel",),                        # megacore on v7x
            allow_input_fusion=[True, False, False, False],           # fuse x relayout
        ),
    )(x_t, w_fused, b_fused, mask)

    out = out[:B]
    return [out[:, col_off[i]:col_off[i] + nfs[i]] for i in range(nb)]


def reference_forward(x, conv_weights, conv_biases, filter_sizes=(3, 4, 5)):
    """Pure-JAX f32 reference mirroring the PyTorch forward."""
    x_bld = jnp.transpose(x, (0, 2, 1))                                   # (B, L, D)
    B, L, D = x_bld.shape
    outs = []
    for w, b, fs in zip(conv_weights, conv_biases, filter_sizes):
        L_out = L - fs + 1
        acc = jnp.zeros((B, L_out, w.shape[0]), jnp.float32)
        for k in range(fs):
            acc = acc + jnp.einsum('btd,fd->btf', x_bld[:, k:k + L_out, :], w[:, :, k])
        acc = acc + b[None, None, :]
        outs.append(jnp.maximum(jnp.max(acc, axis=1), 0.0))              # relu(max_t conv)
    return outs


if __name__ == "__main__":
    # Small shapes consistent with the module (original: d_model=300, nf=100, L~37).
    B, L = 2, 16
    d_model = 32
    num_filters = (16, 16, 16)
    filter_sizes = (3, 4, 5)

    key = jax.random.PRNGKey(0)
    keys = jax.random.split(key, 1 + 2 * len(filter_sizes))

    # x in the (B, d_model, L) layout the PyTorch Conv1d forward consumes.
    x = jax.random.normal(keys[0], (B, d_model, L), dtype=jnp.float32)

    conv_ws, conv_bs = [], []
    for i, (nf, fs) in enumerate(zip(num_filters, filter_sizes)):
        conv_ws.append(0.1 * jax.random.normal(keys[1 + 2 * i], (nf, d_model, fs),
                                               dtype=jnp.float32))
        conv_bs.append(0.1 * jax.random.normal(keys[2 + 2 * i], (nf,), dtype=jnp.float32))

    outs = cnn_layer_forward(x, conv_ws, conv_bs, filter_sizes)
    outs = jax.block_until_ready(outs)

    refs = reference_forward(x, conv_ws, conv_bs, filter_sizes)
    assert len(outs) == len(refs)
    for o, r, nf in zip(outs, refs, num_filters):
        assert o.shape == (B, nf), (o.shape, (B, nf))
        # bf16 MXU operands (f32 accumulation) -> looser tolerance than pure f32.
        assert jnp.allclose(o, r, atol=2e-2, rtol=2e-2), (o, r)

    print("KERNEL_OK")
</pallas_src>

<mosaic_0001>
module attributes {stable_mosaic.version = 11 : i64} {
  func.func @_cnn_layer_kernel(%arg0: i32, %arg1: memref<20x16x128xbf16, #tpu.memory_space<vmem>>, %arg2: memref<5x128x128xbf16, #tpu.memory_space<vmem>>, %arg3: memref<1x128xf32, #tpu.memory_space<vmem>>, %arg4: memref<16x1x128xf32, #tpu.memory_space<vmem>>, %arg5: memref<16x128xf32, #tpu.memory_space<vmem>>, %arg6: memref<128x128xf32, #tpu.memory_space<vmem>>, %arg7: memref<16x128xf32, #tpu.memory_space<vmem>>) attributes {dimension_semantics = [#tpu.dimension_semantics<parallel>], iteration_bounds = array<i64: 1>, scalar_prefetch = 0 : i64, scratch_operands = 2 : i64, tpu.core_type = #tpu.core_type<tc>, window_params = [{transform_indices = @transform_0, window_bounds = array<i64: 20, 16, 128>}, {pipeline_mode = #tpu.pipeline_mode<synchronous>, transform_indices = @transform_1, window_bounds = array<i64: 5, 128, 128>}, {pipeline_mode = #tpu.pipeline_mode<synchronous>, transform_indices = @transform_2, window_bounds = array<i64: 1, 128>}, {pipeline_mode = #tpu.pipeline_mode<synchronous>, transform_indices = @transform_3, window_bounds = array<i64: 16, 1, 128>}, {transform_indices = @transform_4, window_bounds = array<i64: 16, 128>}]} {
    %c0 = arith.constant 0 : index
    %c0_0 = arith.constant 0 : index
    %c0_1 = arith.constant 0 : index
    %0 = vector.load %arg1[%c0, %c0_0, %c0_1] : memref<20x16x128xbf16, #tpu.memory_space<vmem>>, vector<8x16x128xbf16>
    %1 = vector.shape_cast %0 : vector<8x16x128xbf16> to vector<128x128xbf16>
    %c0_2 = arith.constant 0 : index
    %c0_3 = arith.constant 0 : index
    %c0_4 = arith.constant 0 : index
    %2 = vector.load %arg2[%c0_2, %c0_3, %c0_4] : memref<5x128x128xbf16, #tpu.memory_space<vmem>>, vector<1x128x128xbf16>
    %3 = vector.shape_cast %2 : vector<1x128x128xbf16> to vector<128x128xbf16>
    %cst = arith.constant dense<0.000000e+00> : vector<128x128xf32>
    %4 = tpu.matmul %1, %3, %cst {dimension_numbers = #tpu.dot_dimension_numbers<[1], [0], [0], [1], [0, 0, 1, 1], [], []>} : vector<128x128xbf16>, vector<128x128xbf16>, vector<128x128xf32> -> vector<128x128xf32>
    %c0_5 = arith.constant 0 : index
    %c0_6 = arith.constant 0 : index
    %5 = vector.load %arg6[%c0_5, %c0_6] : memref<128x128xf32, #tpu.memory_space<vmem>>, vector<128x128xf32>
    tpu.vector_store %arg6[%c0_5, %c0_6], %4 {strides = array<i32>} : memref<128x128xf32, #tpu.memory_space<vmem>>, vector<128x128xf32>,
    %c1 = arith.constant 1 : index
    %c0_7 = arith.constant 0 : index
    %c0_8 = arith.constant 0 : index
    %6 = vector.load %arg1[%c1, %c0_7, %c0_8] : memref<20x16x128xbf16, #tpu.memory_space<vmem>>, vector<8x16x128xbf16>
    %7 = vector.shape_cast %6 : vector<8x16x128xbf16> to vector<128x128xbf16>
    %c1_9 = arith.constant 1 : index
    %c0_10 = arith.constant 0 : index
    %c0_11 = arith.constant 0 : index
    %8 = vector.load %arg2[%c1_9, %c0_10, %c0_11] : memref<5x128x128xbf16, #tpu.memory_space<vmem>>, vector<1x128x128xbf16>
    %9 = vector.shape_cast %8 : vector<1x128x128xbf16> to vector<128x128xbf16>
    %cst_12 = arith.constant dense<0.000000e+00> : vector<128x128xf32>
    %10 = tpu.matmul %7, %9, %cst_12 {dimension_numbers = #tpu.dot_dimension_numbers<[1], [0], [0], [1], [0, 0, 1, 1], [], []>} : vector<128x128xbf16>, vector<128x128xbf16>, vector<128x128xf32> -> vector<128x128xf32>
    %c0_13 = arith.constant 0 : index
    %c0_14 = arith.constant 0 : index
    %11 = vector.load %arg6[%c0_13, %c0_14] : memref<128x128xf32, #tpu.memory_space<vmem>>, vector<128x128xf32>
    %12 = arith.addf %11, %10 : vector<128x128xf32>
    %c0_15 = arith.constant 0 : index
    %c0_16 = arith.constant 0 : index
    %13 = vector.load %arg6[%c0_15, %c0_16] : memref<128x128xf32, #tpu.memory_space<vmem>>, vector<128x128xf32>
    tpu.vector_store %arg6[%c0_15, %c0_16], %12 {strides = array<i32>} : memref<128x128xf32, #tpu.memory_space<vmem>>, vector<128x128xf32>,
    %c2 = arith.constant 2 : index
    %c0_17 = arith.constant 0 : index
    %c0_18 = arith.constant 0 : index
    %14 = vector.load %arg1[%c2, %c0_17, %c0_18] : memref<20x16x128xbf16, #tpu.memory_space<vmem>>, vector<8x16x128xbf16>
    %15 = vector.shape_cast %14 : vector<8x16x128xbf16> to vector<128x128xbf16>
    %c2_19 = arith.constant 2 : index
    %c0_20 = arith.constant 0 : index
    %c0_21 = arith.constant 0 : index
    %16 = vector.load %arg2[%c2_19, %c0_20, %c0_21] : memref<5x128x128xbf16, #tpu.memory_space<vmem>>, vector<1x128x128xbf16>
    %17 = vector.shape_cast %16 : vector<1x128x128xbf16> to vector<128x128xbf16>
    %cst_22 = arith.constant dense<0.000000e+00> : vector<128x128xf32>
    %18 = tpu.matmul %15, %17, %cst_22 {dimension_numbers = #tpu.dot_dimension_numbers<[1], [0], [0], [1], [0, 0, 1, 1], [], []>} : vector<128x128xbf16>, vector<128x128xbf16>, vector<128x128xf32> -> vector<128x128xf32>
    %c0_23 = arith.constant 0 : index
    %c0_24 = arith.constant 0 : index
    %19 = vector.load %arg6[%c0_23, %c0_24] : memref<128x128xf32, #tpu.memory_space<vmem>>, vector<128x128xf32>
    %20 = arith.addf %19, %18 : vector<128x128xf32>
    %c0_25 = arith.constant 0 : index
    %c0_26 = arith.constant 0 : index
    %21 = vector.load %arg6[%c0_25, %c0_26] : memref<128x128xf32, #tpu.memory_space<vmem>>, vector<128x128xf32>
    tpu.vector_store %arg6[%c0_25, %c0_26], %20 {strides = array<i32>} : memref<128x128xf32, #tpu.memory_space<vmem>>, vector<128x128xf32>,
    %c3 = arith.constant 3 : index
    %c0_27 = arith.constant 0 : index
    %c0_28 = arith.constant 0 : index
    %22 = vector.load %arg1[%c3, %c0_27, %c0_28] : memref<20x16x128xbf16, #tpu.memory_space<vmem>>, vector<8x16x128xbf16>
    %23 = vector.shape_cast %22 : vector<8x16x128xbf16> to vector<128x128xbf16>
    %c3_29 = arith.constant 3 : index
    %c0_30 = arith.constant 0 : index
    %c0_31 = arith.constant 0 : index
    %24 = vector.load %arg2[%c3_29, %c0_30, %c0_31] : memref<5x128x128xbf16, #tpu.memory_space<vmem>>, vector<1x128x128xbf16>
    %25 = vector.shape_cast %24 : vector<1x128x128xbf16> to vector<128x128xbf16>
    %cst_32 = arith.constant dense<0.000000e+00> : vector<128x128xf32>
    %26 = tpu.matmul %23, %25, %cst_32 {dimension_numbers = #tpu.dot_dimension_numbers<[1], [0], [0], [1], [0, 0, 1, 1], [], []>} : vector<128x128xbf16>, vector<128x128xbf16>, vector<128x128xf32> -> vector<128x128xf32>
    %c0_33 = arith.constant 0 : index
    %c0_34 = arith.constant 0 : index
    %27 = vector.load %arg6[%c0_33, %c0_34] : memref<128x128xf32, #tpu.memory_space<vmem>>, vector<128x128xf32>
    %28 = arith.addf %27, %26 : vector<128x128xf32>
    %c0_35 = arith.constant 0 : index
    %c0_36 = arith.constant 0 : index
    %29 = vector.load %arg6[%c0_35, %c0_36] : memref<128x128xf32, #tpu.memory_space<vmem>>, vector<128x128xf32>
    tpu.vector_store %arg6[%c0_35, %c0_36], %28 {strides = array<i32>} : memref<128x128xf32, #tpu.memory_space<vmem>>, vector<128x128xf32>,
    %c4 = arith.constant 4 : index
    %c0_37 = arith.constant 0 : index
    %c0_38 = arith.constant 0 : index
    %30 = vector.load %arg1[%c4, %c0_37, %c0_38] : memref<20x16x128xbf16, #tpu.memory_space<vmem>>, vector<8x16x128xbf16>
    %31 = vector.shape_cast %30 : vector<8x16x128xbf16> to vector<128x128xbf16>
    %c4_39 = arith.constant 4 : index
    %c0_40 = arith.constant 0 : index
    %c0_41 = arith.constant 0 : index
    %32 = vector.load %arg2[%c4_39, %c0_40, %c0_41] : memref<5x128x128xbf16, #tpu.memory_space<vmem>>, vector<1x128x128xbf16>
    %33 = vector.shape_cast %32 : vector<1x128x128xbf16> to vector<128x128xbf16>
    %cst_42 = arith.constant dense<0.000000e+00> : vector<128x128xf32>
    %34 = tpu.matmul %31, %33, %cst_42 {dimension_numbers = #tpu.dot_dimension_numbers<[1], [0], [0], [1], [0, 0, 1, 1], [], []>} : vector<128x128xbf16>, vector<128x128xbf16>, vector<128x128xf32> -> vector<128x128xf32>
    %c0_43 = arith.constant 0 : index
    %c0_44 = arith.constant 0 : index
    %35 = vector.load %arg6[%c0_43, %c0_44] : memref<128x128xf32, #tpu.memory_space<vmem>>, vector<128x128xf32>
    %36 = arith.addf %35, %34 : vector<128x128xf32>
    %c0_45 = arith.constant 0 : index
    %c0_46 = arith.constant 0 : index
    %37 = vector.load %arg6[%c0_45, %c0_46] : memref<128x128xf32, #tpu.memory_space<vmem>>, vector<128x128xf32>
    tpu.vector_store %arg6[%c0_45, %c0_46], %36 {strides = array<i32>} : memref<128x128xf32, #tpu.memory_space<vmem>>, vector<128x128xf32>,
    %c0_47 = arith.constant 0 : index
    %c0_48 = arith.constant 0 : index
    %38 = vector.load %arg6[%c0_47, %c0_48] : memref<128x128xf32, #tpu.memory_space<vmem>>, vector<128x128xf32>
    %39 = vector.shape_cast %38 : vector<128x128xf32> to vector<8x16x128xf32>
    %cst_49 = arith.constant dense<0xFF800000> : vector<16x128xf32>
    %40 = vector.multi_reduction <maximumf>, %39, %cst_49 [0] : vector<8x16x128xf32> to vector<16x128xf32>
    %c0_50 = arith.constant 0 : index
    %c0_51 = arith.constant 0 : index
    %41 = vector.load %arg7[%c0_50, %c0_51] : memref<16x128xf32, #tpu.memory_space<vmem>>, vector<16x128xf32>
    tpu.vector_store %arg7[%c0_50, %c0_51], %40 {strides = array<i32>} : memref<16x128xf32, #tpu.memory_space<vmem>>, vector<16x128xf32>,
    %c8 = arith.constant 8 : index
    %c0_52 = arith.constant 0 : index
    %c0_53 = arith.constant 0 : index
    %42 = vector.load %arg1[%c8, %c0_52, %c0_53] : memref<20x16x128xbf16, #tpu.memory_space<vmem>>, vector<8x16x128xbf16>
    %43 = vector.shape_cast %42 : vector<8x16x128xbf16> to vector<128x128xbf16>
    %c0_54 = arith.constant 0 : index
    %c0_55 = arith.constant 0 : index
    %c0_56 = arith.constant 0 : index
    %44 = vector.load %arg2[%c0_54, %c0_55, %c0_56] : memref<5x128x128xbf16, #tpu.memory_space<vmem>>, vector<1x128x128xbf16>
    %45 = vector.shape_cast %44 : vector<1x128x128xbf16> to vector<128x128xbf16>
    %cst_57 = arith.constant dense<0.000000e+00> : vector<128x128xf32>
    %46 = tpu.matmul %43, %45, %cst_57 {dimension_numbers = #tpu.dot_dimension_numbers<[1], [0], [0], [1], [0, 0, 1, 1], [], []>} : vector<128x128xbf16>, vector<128x128xbf16>, vector<128x128xf32> -> vector<128x128xf32>
    %c0_58 = arith.constant 0 : index
    %c0_59 = arith.constant 0 : index
    %47 = vector.load %arg6[%c0_58, %c0_59] : memref<128x128xf32, #tpu.memory_space<vmem>>, vector<128x128xf32>
    tpu.vector_store %arg6[%c0_58, %c0_59], %46 {strides = array<i32>} : memref<128x128xf32, #tpu.memory_space<vmem>>, vector<128x128xf32>,
    %c9 = arith.constant 9 : index
    %c0_60 = arith.constant 0 : index
    %c0_61 = arith.constant 0 : index
    %48 = vector.load %arg1[%c9, %c0_60, %c0_61] : memref<20x16x128xbf16, #tpu.memory_space<vmem>>, vector<8x16x128xbf16>
    %49 = vector.shape_cast %48 : vector<8x16x128xbf16> to vector<128x128xbf16>
    %c1_62 = arith.constant 1 : index
    %c0_63 = arith.constant 0 : index
    %c0_64 = arith.constant 0 : index
    %50 = vector.load %arg2[%c1_62, %c0_63, %c0_64] : memref<5x128x128xbf16, #tpu.memory_space<vmem>>, vector<1x128x128xbf16>
    %51 = vector.shape_cast %50 : vector<1x128x128xbf16> to vector<128x128xbf16>
    %cst_65 = arith.constant dense<0.000000e+00> : vector<128x128xf32>
    %52 = tpu.matmul %49, %51, %cst_65 {dimension_numbers = #tpu.dot_dimension_numbers<[1], [0], [0], [1], [0, 0, 1, 1], [], []>} : vector<128x128xbf16>, vector<128x128xbf16>, vector<128x128xf32> -> vector<128x128xf32>
    %c0_66 = arith.constant 0 : index
    %c0_67 = arith.constant 0 : index
    %53 = vector.load %arg6[%c0_66, %c0_67] : memref<128x128xf32, #tpu.memory_space<vmem>>, vector<128x128xf32>
    %54 = arith.addf %53, %52 : vector<128x128xf32>
    %c0_68 = arith.constant 0 : index
    %c0_69 = arith.constant 0 : index
    %55 = vector.load %arg6[%c0_68, %c0_69] : memref<128x128xf32, #tpu.memory_space<vmem>>, vector<128x128xf32>
    tpu.vector_store %arg6[%c0_68, %c0_69], %54 {strides = array<i32>} : memref<128x128xf32, #tpu.memory_space<vmem>>, vector<128x128xf32>,
    %c10 = arith.constant 10 : index
    %c0_70 = arith.constant 0 : index
    %c0_71 = arith.constant 0 : index
    %56 = vector.load %arg1[%c10, %c0_70, %c0_71] : memref<20x16x128xbf16, #tpu.memory_space<vmem>>, vector<8x16x128xbf16>
    %57 = vector.shape_cast %56 : vector<8x16x128xbf16> to vector<128x128xbf16>
    %c2_72 = arith.constant 2 : index
    %c0_73 = arith.constant 0 : index
    %c0_74 = arith.constant 0 : index
    %58 = vector.load %arg2[%c2_72, %c0_73, %c0_74] : memref<5x128x128xbf16, #tpu.memory_space<vmem>>, vector<1x128x128xbf16>
    %59 = vector.shape_cast %58 : vector<1x128x128xbf16> to vector<128x128xbf16>
    %cst_75 = arith.constant dense<0.000000e+00> : vector<128x128xf32>
    %60 = tpu.matmul %57, %59, %cst_75 {dimension_numbers = #tpu.dot_dimension_numbers<[1], [0], [0], [1], [0, 0, 1, 1], [], []>} : vector<128x128xbf16>, vector<128x128xbf16>, vector<128x128xf32> -> vector<128x128xf32>
    %c0_76 = arith.constant 0 : index
    %c0_77 = arith.constant 0 : index
    %61 = vector.load %arg6[%c0_76, %c0_77] : memref<128x128xf32, #tpu.memory_space<vmem>>, vector<128x128xf32>
    %62 = arith.addf %61, %60 : vector<128x128xf32>
    %c0_78 = arith.constant 0 : index
    %c0_79 = arith.constant 0 : index
    %63 = vector.load %arg6[%c0_78, %c0_79] : memref<128x128xf32, #tpu.memory_space<vmem>>, vector<128x128xf32>
    tpu.vector_store %arg6[%c0_78, %c0_79], %62 {strides = array<i32>} : memref<128x128xf32, #tpu.memory_space<vmem>>, vector<128x128xf32>,
    %c11 = arith.constant 11 : index
    %c0_80 = arith.constant 0 : index
    %c0_81 = arith.constant 0 : index
    %64 = vector.load %arg1[%c11, %c0_80, %c0_81] : memref<20x16x128xbf16, #tpu.memory_space<vmem>>, vector<8x16x128xbf16>
    %65 = vector.shape_cast %64 : vector<8x16x128xbf16> to vector<128x128xbf16>
    %c3_82 = arith.constant 3 : index
    %c0_83 = arith.constant 0 : index
    %c0_84 = arith.constant 0 : index
    %66 = vector.load %arg2[%c3_82, %c0_83, %c0_84] : memref<5x128x128xbf16, #tpu.memory_space<vmem>>, vector<1x128x128xbf16>
    %67 = vector.shape_cast %66 : vector<1x128x128xbf16> to vector<128x128xbf16>
    %cst_85 = arith.constant dense<0.000000e+00> : vector<128x128xf32>
    %68 = tpu.matmul %65, %67, %cst_85 {dimension_numbers = #tpu.dot_dimension_numbers<[1], [0], [0], [1], [0, 0, 1, 1], [], []>} : vector<128x128xbf16>, vector<128x128xbf16>, vector<128x128xf32> -> vector<128x128xf32>
    %c0_86 = arith.constant 0 : index
    %c0_87 = arith.constant 0 : index
    %69 = vector.load %arg6[%c0_86, %c0_87] : memref<128x128xf32, #tpu.memory_space<vmem>>, vector<128x128xf32>
    %70 = arith.addf %69, %68 : vector<128x128xf32>
    %c0_88 = arith.constant 0 : index
    %c0_89 = arith.constant 0 : index
    %71 = vector.load %arg6[%c0_88, %c0_89] : memref<128x128xf32, #tpu.memory_space<vmem>>, vector<128x128xf32>
    tpu.vector_store %arg6[%c0_88, %c0_89], %70 {strides = array<i32>} : memref<128x128xf32, #tpu.memory_space<vmem>>, vector<128x128xf32>,
    %c12 = arith.constant 12 : index
    %c0_90 = arith.constant 0 : index
    %c0_91 = arith.constant 0 : index
    %72 = vector.load %arg1[%c12, %c0_90, %c0_91] : memref<20x16x128xbf16, #tpu.memory_space<vmem>>, vector<8x16x128xbf16>
    %73 = vector.shape_cast %72 : vector<8x16x128xbf16> to vector<128x128xbf16>
    %c4_92 = arith.constant 4 : index
    %c0_93 = arith.constant 0 : index
    %c0_94 = arith.constant 0 : index
    %74 = vector.load %arg2[%c4_92, %c0_93, %c0_94] : memref<5x128x128xbf16, #tpu.memory_space<vmem>>, vector<1x128x128xbf16>
    %75 = vector.shape_cast %74 : vector<1x128x128xbf16> to vector<128x128xbf16>
    %cst_95 = arith.constant dense<0.000000e+00> : vector<128x128xf32>
    %76 = tpu.matmul %73, %75, %cst_95 {dimension_numbers = #tpu.dot_dimension_numbers<[1], [0], [0], [1], [0, 0, 1, 1], [], []>} : vector<128x128xbf16>, vector<128x128xbf16>, vector<128x128xf32> -> vector<128x128xf32>
    %c0_96 = arith.constant 0 : index
    %c0_97 = arith.constant 0 : index
    %77 = vector.load %arg6[%c0_96, %c0_97] : memref<128x128xf32, #tpu.memory_space<vmem>>, vector<128x128xf32>
    %78 = arith.addf %77, %76 : vector<128x128xf32>
    %c0_98 = arith.constant 0 : index
    %c0_99 = arith.constant 0 : index
    %79 = vector.load %arg6[%c0_98, %c0_99] : memref<128x128xf32, #tpu.memory_space<vmem>>, vector<128x128xf32>
    tpu.vector_store %arg6[%c0_98, %c0_99], %78 {strides = array<i32>} : memref<128x128xf32, #tpu.memory_space<vmem>>, vector<128x128xf32>,
    %c0_100 = arith.constant 0 : index
    %c0_101 = arith.constant 0 : index
    %80 = vector.load %arg6[%c0_100, %c0_101] : memref<128x128xf32, #tpu.memory_space<vmem>>, vector<128x128xf32>
    %81 = vector.shape_cast %80 : vector<128x128xf32> to vector<8x16x128xf32>
    %c8_102 = arith.constant 8 : index
    %c0_103 = arith.constant 0 : index
    %c0_104 = arith.constant 0 : index
    %82 = vector.load %arg4[%c8_102, %c0_103, %c0_104] : memref<16x1x128xf32, #tpu.memory_space<vmem>>, vector<8x1x128xf32>
    %83 = vector.broadcast %82 : vector<8x1x128xf32> to vector<8x16x128xf32>
    %84 = arith.addf %81, %83 : vector<8x16x128xf32>
    %cst_105 = arith.constant dense<0xFF800000> : vector<16x128xf32>
    %85 = vector.multi_reduction <maximumf>, %84, %cst_105 [0] : vector<8x16x128xf32> to vector<16x128xf32>
    %c0_106 = arith.constant 0 : index
    %c0_107 = arith.constant 0 : index
    %86 = vector.load %arg7[%c0_106, %c0_107] : memref<16x128xf32, #tpu.memory_space<vmem>>, vector<16x128xf32>
    %87 = arith.maximumf %86, %85 : vector<16x128xf32>
    %c0_108 = arith.constant 0 : index
    %c0_109 = arith.constant 0 : index
    %88 = vector.load %arg7[%c0_108, %c0_109] : memref<16x128xf32, #tpu.memory_space<vmem>>, vector<16x128xf32>
    tpu.vector_store %arg7[%c0_108, %c0_109], %87 {strides = array<i32>} : memref<16x128xf32, #tpu.memory_space<vmem>>, vector<16x128xf32>,
    %c0_110 = arith.constant 0 : index
    %c0_111 = arith.constant 0 : index
    %89 = vector.load %arg7[%c0_110, %c0_111] : memref<16x128xf32, #tpu.memory_space<vmem>>, vector<16x128xf32>
    %c0_112 = arith.constant 0 : index
    %c0_113 = arith.constant 0 : index
    %90 = vector.load %arg3[%c0_112, %c0_113] : memref<1x128xf32, #tpu.memory_space<vmem>>, vector<1x128xf32>
    %91 = vector.broadcast %90 : vector<1x128xf32> to vector<16x128xf32>
    %92 = arith.addf %89, %91 : vector<16x128xf32>
    %cst_114 = arith.constant 0.000000e+00 : f32
    %93 = vector.broadcast %cst_114 : f32 to vector<16x128xf32>
    %94 = arith.maximumf %92, %93 : vector<16x128xf32>
    %c0_115 = arith.constant 0 : index
    %c0_116 = arith.constant 0 : index
    %95 = vector.load %arg5[%c0_115, %c0_116] : memref<16x128xf32, #tpu.memory_space<vmem>>, vector<16x128xf32>
    tpu.vector_store %arg5[%c0_115, %c0_116], %94 {strides = array<i32>} : memref<16x128xf32, #tpu.memory_space<vmem>>, vector<16x128xf32>,
    return
  }
  func.func @transform_0(%arg0: i32) -> (i32, i32, i32) {
    %c0_i32 = arith.constant 0 : i32
    %c0_i32_0 = arith.constant 0 : i32
    %c0_i32_1 = arith.constant 0 : i32
    return %c0_i32, %arg0, %c0_i32_0 : i32, i32, i32
  }
  func.func @transform_1(%arg0: i32) -> (i32, i32, i32) {
    %c0_i32 = arith.constant 0 : i32
    %c0_i32_0 = arith.constant 0 : i32
    %c0_i32_1 = arith.constant 0 : i32
    %c0_i32_2 = arith.constant 0 : i32
    return %c0_i32, %c0_i32_0, %c0_i32_1 : i32, i32, i32
  }
  func.func @transform_2(%arg0: i32) -> (i32, i32) {
    %c0_i32 = arith.constant 0 : i32
    %c0_i32_0 = arith.constant 0 : i32
    %c0_i32_1 = arith.constant 0 : i32
    return %c0_i32, %c0_i32_0 : i32, i32
  }
  func.func @transform_3(%arg0: i32) -> (i32, i32, i32) {
    %c0_i32 = arith.constant 0 : i32
    %c0_i32_0 = arith.constant 0 : i32
    %c0_i32_1 = arith.constant 0 : i32
    %c0_i32_2 = arith.constant 0 : i32
    return %c0_i32, %c0_i32_0, %c0_i32_1 : i32, i32, i32
  }
  func.func @transform_4(%arg0: i32) -> (i32, i32) {
    %c0_i32 = arith.constant 0 : i32
    %c0_i32_0 = arith.constant 0 : i32
    return %arg0, %c0_i32 : i32, i32
  }
}

</mosaic_0001>

<bundles_post_ra>
// kernel: tpu_custom_call.1
= control target key start
LH: loop header
LB: loop body
LE: loop exit
PB: predicated region body
PF: predicated region fallthrough
CT: control target
= control target key end

     0   :  { %9 = vsyncpa [#allocation5], 0  ;;  %s3964_s0 = inlined_call_operand.hbm [shape: bf16[20,16,128], index: 0, kind: input, shape index: {}]   ;;  %s3965_s1 = inlined_call_operand.hbm [shape: bf16[5,128,128], index: 1, kind: input, shape index: {}]   ;;  %s3966_s2 = inlined_call_operand.vmem [shape: f32[1,128], index: 2, kind: input, shape index: {}]   ;;  %s3967_s3 = inlined_call_operand.hbm [shape: f32[16,1,128], index: 3, kind: input, shape index: {}]   ;;  %s3968_s4 = inlined_call_operand.hbm [shape: f32[16,128], index: 4, kind: output, shape index: {}]  }
   0x1   :  { %10 = vsyncpa [#allocation8], 0 }
   0x2   :  { %11 = vsyncpa [#allocation6], 0  ;;  %s3818_s15 = smov [#allocation7]   ;;  %s3819_s17 = smov [#allocation4]  }
   0x3   :  { %s29_s16 = sshll.u32 %s3818_s15, 4  ;;  %s17_s18 = sshll.u32 %s3819_s17, 4  ;;  %s30_s16 = int_to_ptr.vmem [resolvable:$true] %s29_s16  ;;  %s18_s18 = int_to_ptr.vmem [resolvable:$true] %s17_s18 }
   0x4   :  { %s3740_s19 = scalar_lea.vmem %s30_s16, 5120  ;;  %p3745_p1 = scmp.lt.s32.totalorder %s30_s16, %s30_s16 }
   0x5   :  { %p3741_p0 = scmp.ne.s32.totalorder %s30_s16, %s3740_s19  ;;  %p3746_p2 = scmp.lt.s32.totalorder %s3740_s19, %s3740_s19 }
   0x7   :  { %p3747_p3 = por %p3746_p2, %p3745_p1 }
   0x9   :  { %p3748_p4 = pnand %p3747_p3, %p3741_p0 }
   0xb   :  { %3751 = shalt.err (!%p3748_p4)
}
   0xc   :  { %s3820_s20 = smov 64   ;;  %s3821_s21 = smov 4  }
   0xd   :  { %35 = dma.hbm_to_vmem [thread:$0]  %s3965_s1, 5120, %s30_s16, [#allocation8], %s3820_s20, %s3820_s20, %s3821_s21  }
   0xe   :  { %s3760_s24 = scalar_lea.vmem %s18_s18, 2560  ;;  %p3765_p6 = scmp.lt.s32.totalorder %s18_s18, %s18_s18 }
   0xf   :  { %p3761_p5 = scmp.ne.s32.totalorder %s18_s18, %s3760_s24  ;;  %p3766_p7 = scmp.lt.s32.totalorder %s3760_s24, %s3760_s24 }
  0x11   :  { %p3767_p8 = por %p3766_p7, %p3765_p6 }
  0x13   :  { %p3768_p9 = pnand %p3767_p8, %p3761_p5 }
  0x15   :  { %3771 = shalt.err (!%p3768_p9)
}
  0x16   :  { %23 = dma.hbm_to_vmem [thread:$0]  %s3964_s0, 2560, %s18_s18, [#allocation5], %s3820_s20, %s3820_s20, %s3821_s21  }
  0x17   :  { %s3822_s27 = smov [#allocation9]  }
  0x18   :  { %s43_s28 = sshll.u32 %s3822_s27, 4  ;;  %s44_s28 = int_to_ptr.vmem [resolvable:$true] %s43_s28 }
  0x19   :  { %s3780_s29 = scalar_lea.vmem %s44_s28, 256  ;;  %p3785_p11 = scmp.lt.s32.totalorder %s44_s28, %s44_s28 }
  0x1a   :  { %p3781_p10 = scmp.ne.s32.totalorder %s44_s28, %s3780_s29  ;;  %p3786_p12 = scmp.lt.s32.totalorder %s3780_s29, %s3780_s29 }
  0x1c   :  { %p3787_p13 = por %p3786_p12, %p3785_p11 }
  0x1e   :  { %p3788_p0 = pnand %p3787_p13, %p3781_p10 }
  0x20   :  { %3791 = shalt.err (!%p3788_p0)
}
  0x21   :  { %s3823_s1 = smov 16   ;;  %s3824_s30 = smov 1  }
  0x22   :  { %49 = dma.hbm_to_vmem [thread:$0]  %s3967_s3, 256, %s44_s28, [#allocation8], %s3823_s1, %s3823_s1, %s3824_s30  }
  0x23   :  { %3812 = dma.done.wait [#allocation5], 2560  }
  0x24   :  { %3813 = vsyncadd [#allocation5], 4294964736 }
  0x25   :  { %3814 = dma.done.wait [#allocation8], 5376  }
  0x26   :  { %3815 = vsyncadd [#allocation8], 4294961920  ;;  %v3572_v0 = vld [vmem:[#allocation7 + $0x38] sm:$0xff]   ;;  %v3574_v2 = vld [vmem:[#allocation7 + $0x30] sm:$0xff]   ;;  %s3825_s7 = smov [#allocation10]  }
  0x27   :  { %v3573_v1 = vld [vmem:[#allocation7 + $0x78] sm:$0xff]   ;;  %3242 = vmatprep.subr.bf16.mxu0 %v3572_v0  ;;  %v3575_v3 = vld [vmem:[#allocation7 + $0x70] sm:$0xff]   ;;  %v3576_v4 = vld [vmem:[#allocation7 + $0x28] sm:$0xff]   ;;  %s2900_s8 = sshll.u32 %s3825_s7, 4  ;;  %s2901_s8 = int_to_ptr.vmem [resolvable:$true] %s2900_s8 }
  0x28   :  { %3274 = vmatprep.subr.bf16.mxu1 %v3573_v1  ;;  %3243 = vmatpush3.bf16.msra.mxu0 %v3572_v0  ;;  %v3577_v5 = vld [vmem:[#allocation7 + $0x68] sm:$0xff]   ;;  %v3578_v6 = vld [vmem:[#allocation7 + $0x20] sm:$0xff]   ;;  %v3580_v8 = vld [vmem:[#allocation7 + $0x18] sm:$0xff]   ;;  %s3792_s9 = scalar_lea.vmem %s2901_s8, 256  ;;  %p3797_p2 = scmp.lt.s32.totalorder %s2901_s8, %s2901_s8 }
  0x29   :  { %3275 = vmatpush3.bf16.msra.mxu1 %v3573_v1  ;;  %3244 = vmatprep.subr.bf16.mxu0 %v3574_v2  ;;  %v3579_v7 = vld [vmem:[#allocation7 + $0x60] sm:$0xff]   ;;  %v3581_v9 = vld [vmem:[#allocation7 + $0x58] sm:$0xff]   ;;  %v3582_v10 = vld [vmem:[#allocation7 + $0x10] sm:$0xff]   ;;  %p3793_p1 = scmp.ne.s32.totalorder %s2901_s8, %s3792_s9  ;;  %p3798_p3 = scmp.lt.s32.totalorder %s3792_s9, %s3792_s9 }
  0x2a   :  { %3276 = vmatprep.subr.bf16.mxu1 %v3575_v3  ;;  %v3583_v11 = vld [vmem:[#allocation7 + $0x50] sm:$0xff]   ;;  %v3588_v12 = vld [vmem:[#allocation4] sm:$0xff]   ;;  %v3589_v13 = vld [vmem:[#allocation4 + $0x8] sm:$0xff]  }
  0x2b   :  { %3258 = vmatprep.mubr.bf16.mxu0 %v3588_v12  ;;  %3290 = vmatprep.mubr.bf16.mxu1 %v3589_v13  ;;  %v3584_v14 = vld [vmem:[#allocation7 + $0x8] sm:$0xff]   ;;  %v3586_v16 = vld [vmem:[#allocation7] sm:$0xff]   ;;  %v3592_v19 = vld [vmem:[#allocation7 + $0xb8] sm:$0xff]   ;;  %p3799_p4 = por %p3798_p3, %p3797_p2 }
  0x2c   :  { %3245 = vmatpush3.bf16.msra.mxu0 %v3574_v2  ;;  %v3585_v15 = vld [vmem:[#allocation7 + $0x48] sm:$0xff]   ;;  %v3587_v17 = vld [vmem:[#allocation7 + $0x40] sm:$0xff]   ;;  %v3593_v20 = vld [vmem:[#allocation7 + $0xf8] sm:$0xff]  }
  0x2d   :  { %3277 = vmatpush3.bf16.msra.mxu1 %v3575_v3  ;;  %3246 = vmatprep.subr.bf16.mxu0 %v3576_v4  ;;  %v3590_v18 = vld [vmem:[#allocation4 + $0x8] sm:$0xff]   ;;  %v3591_v21 = vld [vmem:[#allocation4 + $0x10] sm:$0xff]   ;;  %v3597_v25 = vld [vmem:[#allocation4 + $0x18] sm:$0xff]   ;;  %p3800_p5 = pnand %p3799_p4, %p3793_p1 }
  0x2e   :  { %3278 = vmatprep.subr.bf16.mxu1 %v3577_v5  ;;  %v3594_v22 = vld [vmem:[#allocation7 + $0xb0] sm:$0xff]   ;;  %v3598_v26 = vld [vmem:[#allocation4 + $0x18] sm:$0xff]   ;;  %v3600_v27 = vld [vmem:[#allocation7 + $0xa8] sm:$0xff]  }
  0x2f   :  { %v3595_v23 = vld [vmem:[#allocation7 + $0xf0] sm:$0xff]   ;;  %v3601_v28 = vld [vmem:[#allocation7 + $0xe8] sm:$0xff]   ;;  %v3599_v29 = vld [vmem:[#allocation4 + $0x20] sm:$0xff]  }
  0x30   :  { %3247 = vmatpush3.bf16.msra.mxu0 %v3576_v4  ;;  %v3596_v24 = vld [vmem:[#allocation4 + $0x10] sm:$0xff]   ;;  %v3602_v30 = vld [vmem:[#allocation7 + $0xa0] sm:$0xff]   ;;  %v3605_v33 = vld [vmem:[#allocation4 + $0x28] sm:$0xff]  }
  0x31   :  { %3279 = vmatpush3.bf16.msra.mxu1 %v3577_v5  ;;  %3248 = vmatprep.subr.bf16.mxu0 %v3578_v6  ;;  %v3603_v31 = vld [vmem:[#allocation7 + $0xe0] sm:$0xff]   ;;  %v3606_v34 = vld [vmem:[#allocation4 + $0x28] sm:$0xff]   ;;  %v3608_v35 = vld [vmem:[#allocation7 + $0x98] sm:$0xff]  }
  0x32   :  { %3280 = vmatprep.subr.bf16.mxu1 %v3579_v7  ;;  %v3604_v32 = vld [vmem:[#allocation4 + $0x20] sm:$0xff]   ;;  %v3609_v36 = vld [vmem:[#allocation7 + $0xd8] sm:$0xff]   ;;  %v3607_v37 = vld [vmem:[#allocation4 + $0x30] sm:$0xff]  }
  0x33   :  { %v3610_v38 = vld [vmem:[#allocation7 + $0x90] sm:$0xff]   ;;  %v3613_v41 = vld [vmem:[#allocation4 + $0x38] sm:$0xff]   ;;  %v3616_v43 = vld [vmem:[#allocation7 + $0x88] sm:$0xff]  }
  0x34   :  { %3249 = vmatpush3.bf16.msra.mxu0 %v3578_v6  ;;  %v3611_v39 = vld [vmem:[#allocation7 + $0xd0] sm:$0xff]   ;;  %v3614_v42 = vld [vmem:[#allocation4 + $0x38] sm:$0xff]   ;;  %v3617_v44 = vld [vmem:[#allocation7 + $0xc8] sm:$0xff]  }
  0x35   :  { %3281 = vmatpush3.bf16.msra.mxu1 %v3579_v7  ;;  %3250 = vmatprep.subr.bf16.mxu0 %v3580_v8  ;;  %v3612_v40 = vld [vmem:[#allocation4 + $0x30] sm:$0xff]   ;;  %v3615_v45 = vld [vmem:[#allocation4 + $0x40] sm:$0xff]   ;;  %v3621_v49 = vld [vmem:[#allocation4 + $0x18] sm:$0xff]  }
  0x36   :  { %3282 = vmatprep.subr.bf16.mxu1 %v3581_v9  ;;  %v3618_v46 = vld [vmem:[#allocation7 + $0x80] sm:$0xff]   ;;  %v3620_v48 = vld [vmem:[#allocation4 + $0x10] sm:$0xff]   ;;  %v3622_v50 = vld [vmem:[#allocation4 + $0x18] sm:$0xff]  }
  0x37   :  { %v3619_v47 = vld [vmem:[#allocation7 + $0xc0] sm:$0xff]   ;;  %v3624_v51 = vld [vmem:[#allocation7 + $0x138] sm:$0xff]   ;;  %v3626_v54 = vld [vmem:[#allocation7 + $0x130] sm:$0xff]  }
  0x38   :  { %3251 = vmatpush3.bf16.msra.mxu0 %v3580_v8  ;;  %v3625_v52 = vld [vmem:[#allocation7 + $0x38] sm:$0xff]   ;;  %v3623_v53 = vld [vmem:[#allocation4 + $0x20] sm:$0xff]   ;;  %v3627_v55 = vld [vmem:[#allocation7 + $0x30] sm:$0xff]  }
  0x39   :  { %3283 = vmatpush3.bf16.msra.mxu1 %v3581_v9  ;;  %3252 = vmatprep.subr.bf16.mxu0 %v3582_v10  ;;  %v3628_v56 = vld [vmem:[#allocation4 + $0x20] sm:$0xff]   ;;  %v3629_v57 = vld [vmem:[#allocation4 + $0x28] sm:$0xff]   ;;  %v3631_v61 = vld [vmem:[#allocation4 + $0x30] sm:$0xff]  }
  0x3a   :  { %3284 = vmatprep.subr.bf16.mxu1 %v3583_v11  ;;  %v3630_v58 = vld [vmem:[#allocation4 + $0x28] sm:$0xff]   ;;  %v3634_v62 = vld [vmem:[#allocation7 + $0x120] sm:$0xff]   ;;  %v3636_v0 = vld [vmem:[#allocation4 + $0x30] sm:$0xff]  }
  0x3b   :  { %v3632_v59 = vld [vmem:[#allocation7 + $0x128] sm:$0xff]   ;;  %v3635_v63 = vld [vmem:[#allocation7 + $0x20] sm:$0xff]   ;;  %v3637_v1 = vld [vmem:[#allocation4 + $0x38] sm:$0xff]  }
  0x3c   :  { %3253 = vmatpush3.bf16.msra.mxu0 %v3582_v10  ;;  %v3633_v60 = vld [vmem:[#allocation7 + $0x28] sm:$0xff]   ;;  %v3638_v2 = vld [vmem:[#allocation4 + $0x38] sm:$0xff]   ;;  %v3639_v5 = vld [vmem:[#allocation4 + $0x40] sm:$0xff]  }
  0x3d   :  { %3285 = vmatpush3.bf16.msra.mxu1 %v3583_v11  ;;  %3254 = vmatprep.subr.bf16.mxu0 %v3584_v14  ;;  %v3640_v3 = vld [vmem:[#allocation7 + $0x118] sm:$0xff]   ;;  %v3642_v6 = vld [vmem:[#allocation7 + $0x110] sm:$0xff]   ;;  %v3644_v8 = vld [vmem:[#allocation4 + $0x40] sm:$0xff]  }
  0x3e   :  { %3286 = vmatprep.subr.bf16.mxu1 %v3585_v15  ;;  %v3641_v4 = vld [vmem:[#allocation7 + $0x18] sm:$0xff]   ;;  %v3643_v7 = vld [vmem:[#allocation7 + $0x10] sm:$0xff]   ;;  %v3645_v9 = vld [vmem:[#allocation4 + $0x48] sm:$0xff]  }
  0x3f   :  { %v3646_v10 = vld [vmem:[#allocation4 + $0x48] sm:$0xff]   ;;  %v3647_v13 = vld [vmem:[#allocation4 + $0x50] sm:$0xff]  }
  0x40   :  { %3255 = vmatpush3.bf16.msra.mxu0 %v3584_v14  ;;  %v3648_v11 = vld [vmem:[#allocation7 + $0x108] sm:$0xff]   ;;  %v3650_v14 = vld [vmem:[#allocation7 + $0x100] sm:$0xff]  }
  0x41   :  { %3287 = vmatpush3.bf16.msra.mxu1 %v3585_v15  ;;  %3256 = vmatprep.subr.bf16.mxu0 %v3586_v16  ;;  %v3649_v12 = vld [vmem:[#allocation7 + $0x8] sm:$0xff]   ;;  %v3651_v15 = vld [vmem:[#allocation7] sm:$0xff]  }
  0x42   :  { %3288 = vmatprep.subr.bf16.mxu1 %v3587_v17 }
  0x44   :  { %3257 = vmatpush3.bf16.msra.mxu0 %v3586_v16  ;;  %v3652_v16 = vld [vmem:[#allocation4 + $0x20] sm:$0xff]  }
  0x45   :  { %3289 = vmatpush3.bf16.msra.mxu1 %v3587_v17  ;;  %3306 = vmatprep.subr.bf16.mxu0 %v3592_v19  ;;  %v3653_v17 = vld [vmem:[#allocation4 + $0x40] sm:$0xff]  }
  0x46   :  { %3338 = vmatprep.subr.bf16.mxu1 %v3593_v20 }
  0x47   :  { %3259 = vmatmul.mubr.bf16.vlgmr.msra.gmra.mxu0 %v3590_v18  ;;  %v3654_v18 = vld [vmem:[#allocation4 + $0x28] sm:$0xff]  }
  0x48   :  { %3291 = vmatmul.mubr.bf16.vlgmr.msra.gmra.mxu1 %v3591_v21  ;;  %3307 = vmatpush3.bf16.msra.mxu0 %v3592_v19  ;;  %v3656_v19 = vld [vmem:[#allocation7 + $0x78] sm:$0xff]   ;;  %v3655_v21 = vld [vmem:[#allocation4 + $0x48] sm:$0xff]  }
  0x49   :  { %3339 = vmatpush3.bf16.msra.mxu1 %v3593_v20  ;;  %3308 = vmatprep.subr.bf16.mxu0 %v3594_v22  ;;  %v3657_v20 = vld [vmem:[#allocation7 + $0xb8] sm:$0xff]  }
  0x4a   :  { %3340 = vmatprep.subr.bf16.mxu1 %v3595_v23  ;;  %3262 = vmatprep.mubr.bf16.mxu0 %v3596_v24  ;;  %v3660_v24 = vld [vmem:[#allocation4 + $0x30] sm:$0xff]  }
  0x4b   :  { %3294 = vmatprep.mubr.bf16.mxu1 %v3597_v25  ;;  %v3661_v25 = vld [vmem:[#allocation4 + $0x50] sm:$0xff]  }
  0x4c   :  { %3309 = vmatpush3.bf16.msra.mxu0 %v3594_v22  ;;  %v3658_v22 = vld [vmem:[#allocation7 + $0x70] sm:$0xff]  }
  0x4d   :  { %3341 = vmatpush3.bf16.msra.mxu1 %v3595_v23  ;;  %3310 = vmatprep.subr.bf16.mxu0 %v3600_v27  ;;  %v3659_v23 = vld [vmem:[#allocation7 + $0xb0] sm:$0xff]  }
  0x4e   :  { %3342 = vmatprep.subr.bf16.mxu1 %v3601_v28 }
  0x4f   :  { %3263 = vmatmul.mubr.bf16.gmra.mxu0 %v3598_v26  ;;  %v3662_v26 = vld [vmem:[#allocation4 + $0x38] sm:$0xff]  }
  0x50   :  { %3295 = vmatmul.mubr.bf16.gmra.mxu1 %v3599_v29  ;;  %3311 = vmatpush3.bf16.msra.mxu0 %v3600_v27  ;;  %v3664_v27 = vld [vmem:[#allocation7 + $0x68] sm:$0xff]   ;;  %v3663_v29 = vld [vmem:[#allocation4 + $0x58] sm:$0xff]  }
  0x51   :  { %3343 = vmatpush3.bf16.msra.mxu1 %v3601_v28  ;;  %3312 = vmatprep.subr.bf16.mxu0 %v3602_v30  ;;  %v3665_v28 = vld [vmem:[#allocation7 + $0xa8] sm:$0xff]  }
  0x52   :  { %3344 = vmatprep.subr.bf16.mxu1 %v3603_v31  ;;  %3266 = vmatprep.mubr.bf16.mxu0 %v3604_v32  ;;  %v3668_v32 = vld [vmem:[#allocation4 + $0x40] sm:$0xff]  }
  0x53   :  { %3298 = vmatprep.mubr.bf16.mxu1 %v3605_v33  ;;  %v3669_v33 = vld [vmem:[#allocation4 + $0x60] sm:$0xff]  }
  0x54   :  { %3313 = vmatpush3.bf16.msra.mxu0 %v3602_v30  ;;  %v3666_v30 = vld [vmem:[#allocation7 + $0x60] sm:$0xff]  }
  0x55   :  { %3345 = vmatpush3.bf16.msra.mxu1 %v3603_v31  ;;  %3314 = vmatprep.subr.bf16.mxu0 %v3608_v35  ;;  %v3667_v31 = vld [vmem:[#allocation7 + $0xa0] sm:$0xff]  }
  0x56   :  { %3346 = vmatprep.subr.bf16.mxu1 %v3609_v36 }
  0x57   :  { %3267 = vmatmul.mubr.bf16.gmra.mxu0 %v3606_v34  ;;  %v3670_v34 = vld [vmem:[#allocation4 + $0x48] sm:$0xff]  }
  0x58   :  { %3299 = vmatmul.mubr.bf16.gmra.mxu1 %v3607_v37  ;;  %3315 = vmatpush3.bf16.msra.mxu0 %v3608_v35  ;;  %v3672_v35 = vld [vmem:[#allocation7 + $0x58] sm:$0xff]   ;;  %v3671_v37 = vld [vmem:[#allocation4 + $0x68] sm:$0xff]  }
  0x59   :  { %3347 = vmatpush3.bf16.msra.mxu1 %v3609_v36  ;;  %3316 = vmatprep.subr.bf16.mxu0 %v3610_v38  ;;  %v3673_v36 = vld [vmem:[#allocation7 + $0x98] sm:$0xff]  }
  0x5a   :  { %3348 = vmatprep.subr.bf16.mxu1 %v3611_v39  ;;  %3270 = vmatprep.mubr.bf16.mxu0 %v3612_v40  ;;  %v3676_v40 = vld [vmem:[#allocation4 + $0x50] sm:$0xff]  }
  0x5b   :  { %3302 = vmatprep.mubr.bf16.mxu1 %v3613_v41  ;;  %v3677_v41 = vld [vmem:[#allocation4 + $0x70] sm:$0xff]  }
  0x5c   :  { %3317 = vmatpush3.bf16.msra.mxu0 %v3610_v38  ;;  %v3674_v38 = vld [vmem:[#allocation7 + $0x50] sm:$0xff]  }
  0x5d   :  { %3349 = vmatpush3.bf16.msra.mxu1 %v3611_v39  ;;  %3318 = vmatprep.subr.bf16.mxu0 %v3616_v43  ;;  %v3675_v39 = vld [vmem:[#allocation7 + $0x90] sm:$0xff]  }
  0x5e   :  { %3350 = vmatprep.subr.bf16.mxu1 %v3617_v44 }
  0x5f   :  { %3271 = vmatmul.mubr.bf16.gmra.mxu0 %v3614_v42  ;;  %v3678_v42 = vld [vmem:[#allocation4 + $0x58] sm:$0xff]  }
  0x60   :  { %3303 = vmatmul.mubr.bf16.gmra.mxu1 %v3615_v45  ;;  %3319 = vmatpush3.bf16.msra.mxu0 %v3616_v43  ;;  %v3680_v43 = vld [vmem:[#allocation7 + $0x48] sm:$0xff]   ;;  %v3679_v45 = vld [vmem:[#allocation4 + $0x78] sm:$0xff]  }
  0x61   :  { %3351 = vmatpush3.bf16.msra.mxu1 %v3617_v44  ;;  %3320 = vmatprep.subr.bf16.mxu0 %v3618_v46  ;;  %v3681_v44 = vld [vmem:[#allocation7 + $0x88] sm:$0xff]  }
  0x62   :  { %3352 = vmatprep.subr.bf16.mxu1 %v3619_v47  ;;  %3322 = vmatprep.mubr.bf16.mxu0 %v3620_v48  ;;  %v3684_v48 = vld [vmem:[#allocation4 + $0x48] sm:$0xff]  }
  0x63   :  { %3354 = vmatprep.mubr.bf16.mxu1 %v3621_v49  ;;  %v3685_v49 = vld [vmem:[#allocation4 + $0x50] sm:$0xff]  }
  0x64   :  { %3321 = vmatpush3.bf16.msra.mxu0 %v3618_v46  ;;  %v3682_v46 = vld [vmem:[#allocation7 + $0x40] sm:$0xff]  }
  0x65   :  { %3353 = vmatpush3.bf16.msra.mxu1 %v3619_v47  ;;  %3370 = vmatprep.subr.bf16.mxu0 %v3624_v51  ;;  %v3683_v47 = vld [vmem:[#allocation7 + $0x80] sm:$0xff]  }
  0x66   :  { %3402 = vmatprep.subr.bf16.mxu1 %v3625_v52 }
  0x67   :  { %3323 = vmatmul.mubr.bf16.vlgmr.msra.gmra.mxu0 %v3622_v50  ;;  %v3686_v50 = vld [vmem:[#allocation4 + $0x50] sm:$0xff]  }
  0x68   :  { %3355 = vmatmul.mubr.bf16.vlgmr.msra.gmra.mxu1 %v3623_v53  ;;  %3371 = vmatpush3.bf16.msra.mxu0 %v3624_v51  ;;  %v3688_v51 = vld [vmem:[#allocation7 + $0xf8] sm:$0xff]  }
  0x69   :  { %3403 = vmatpush3.bf16.msra.mxu1 %v3625_v52  ;;  %3372 = vmatprep.subr.bf16.mxu0 %v3626_v54  ;;  %v3689_v52 = vld [vmem:[#allocation7 + $0x138] sm:$0xff]  }
  0x6a   :  { %3404 = vmatprep.subr.bf16.mxu1 %v3627_v55  ;;  %3326 = vmatprep.mubr.bf16.mxu0 %v3628_v56  ;;  %v3687_v53 = vld [vmem:[#allocation4 + $0x58] sm:$0xff]  }
  0x6b   :  { %3358 = vmatprep.mubr.bf16.mxu1 %v3629_v57  ;;  %v3692_v56 = vld [vmem:[#allocation4 + $0x58] sm:$0xff]   ;;  %v3693_v57 = vld [vmem:[#allocation4 + $0x60] sm:$0xff]  }
  0x6c   :  { %3373 = vmatpush3.bf16.msra.mxu0 %v3626_v54  ;;  %v3690_v54 = vld [vmem:[#allocation7 + $0xf0] sm:$0xff]  }
  0x6d   :  { %3405 = vmatpush3.bf16.msra.mxu1 %v3627_v55  ;;  %3374 = vmatprep.subr.bf16.mxu0 %v3632_v59  ;;  %v3691_v55 = vld [vmem:[#allocation7 + $0x130] sm:$0xff]  }
  0x6e   :  { %3406 = vmatprep.subr.bf16.mxu1 %v3633_v60 }
  0x6f   :  { %3327 = vmatmul.mubr.bf16.gmra.mxu0 %v3630_v58  ;;  %v3694_v58 = vld [vmem:[#allocation4 + $0x60] sm:$0xff]  }
  0x70   :  { %3359 = vmatmul.mubr.bf16.gmra.mxu1 %v3631_v61  ;;  %3375 = vmatpush3.bf16.msra.mxu0 %v3632_v59  ;;  %v3696_v59 = vld [vmem:[#allocation7 + $0xe8] sm:$0xff]  }
  0x71   :  { %3407 = vmatpush3.bf16.msra.mxu1 %v3633_v60  ;;  %3376 = vmatprep.subr.bf16.mxu0 %v3634_v62  ;;  %v3697_v60 = vld [vmem:[#allocation7 + $0x128] sm:$0xff]  }
  0x72   :  { %3408 = vmatprep.subr.bf16.mxu1 %v3635_v63  ;;  %3330 = vmatprep.mubr.bf16.mxu0 %v3636_v0  ;;  %v3695_v61 = vld [vmem:[#allocation4 + $0x68] sm:$0xff]  }
  0x73   :  { %3362 = vmatprep.mubr.bf16.mxu1 %v3637_v1  ;;  %v3700_v0 = vld [vmem:[#allocation4 + $0x68] sm:$0xff]   ;;  %v3701_v1 = vld [vmem:[#allocation4 + $0x70] sm:$0xff]  }
  0x74   :  { %3377 = vmatpush3.bf16.msra.mxu0 %v3634_v62  ;;  %v3698_v62 = vld [vmem:[#allocation7 + $0xe0] sm:$0xff]  }
  0x75   :  { %3409 = vmatpush3.bf16.msra.mxu1 %v3635_v63  ;;  %3378 = vmatprep.subr.bf16.mxu0 %v3640_v3  ;;  %v3699_v63 = vld [vmem:[#allocation7 + $0x120] sm:$0xff]  }
  0x76   :  { %3410 = vmatprep.subr.bf16.mxu1 %v3641_v4 }
  0x77   :  { %3331 = vmatmul.mubr.bf16.gmra.mxu0 %v3638_v2  ;;  %v3702_v2 = vld [vmem:[#allocation4 + $0x70] sm:$0xff]  }
  0x78   :  { %3363 = vmatmul.mubr.bf16.gmra.mxu1 %v3639_v5  ;;  %3379 = vmatpush3.bf16.msra.mxu0 %v3640_v3  ;;  %v3704_v3 = vld [vmem:[#allocation7 + $0xd8] sm:$0xff]  }
  0x79   :  { %3411 = vmatpush3.bf16.msra.mxu1 %v3641_v4  ;;  %3380 = vmatprep.subr.bf16.mxu0 %v3642_v6  ;;  %v3705_v4 = vld [vmem:[#allocation7 + $0x118] sm:$0xff]  }
  0x7a   :  { %3412 = vmatprep.subr.bf16.mxu1 %v3643_v7  ;;  %3334 = vmatprep.mubr.bf16.mxu0 %v3644_v8  ;;  %v3703_v5 = vld [vmem:[#allocation4 + $0x78] sm:$0xff]  }
  0x7b   :  { %3366 = vmatprep.mubr.bf16.mxu1 %v3645_v9  ;;  %v3708_v8 = vld [vmem:[#allocation4 + $0x78] sm:$0xff]   ;;  %v3709_v9 = vld [vmem:[#allocation4 + $0x80] sm:$0xff]  }
  0x7c   :  { %3381 = vmatpush3.bf16.msra.mxu0 %v3642_v6  ;;  %v3706_v6 = vld [vmem:[#allocation7 + $0xd0] sm:$0xff]  }
  0x7d   :  { %3413 = vmatpush3.bf16.msra.mxu1 %v3643_v7  ;;  %3382 = vmatprep.subr.bf16.mxu0 %v3648_v11  ;;  %v3707_v7 = vld [vmem:[#allocation7 + $0x110] sm:$0xff]  }
  0x7e   :  { %3414 = vmatprep.subr.bf16.mxu1 %v3649_v12 }
  0x7f   :  { %3335 = vmatmul.mubr.bf16.gmra.mxu0 %v3646_v10  ;;  %v3710_v10 = vld [vmem:[#allocation4 + $0x80] sm:$0xff]  }
  0x80   :  { %3367 = vmatmul.mubr.bf16.gmra.mxu1 %v3647_v13  ;;  %3383 = vmatpush3.bf16.msra.mxu0 %v3648_v11  ;;  %v3712_v11 = vld [vmem:[#allocation7 + $0xc8] sm:$0xff]  }
  0x81   :  { %3415 = vmatpush3.bf16.msra.mxu1 %v3649_v12  ;;  %3384 = vmatprep.subr.bf16.mxu0 %v3650_v14  ;;  %v3713_v12 = vld [vmem:[#allocation7 + $0x108] sm:$0xff]  }
  0x82   :  { %3416 = vmatprep.subr.bf16.mxu1 %v3651_v15  ;;  %3386 = vmatprep.mubr.bf16.mxu0 %v3652_v16  ;;  %v3711_v13 = vld [vmem:[#allocation4 + $0x88] sm:$0xff]   ;;  %v3716_v16 = vld [vmem:[#allocation4 + $0x58] sm:$0xff]  }
  0x83   :  { %3418 = vmatprep.mubr.bf16.mxu1 %v3653_v17  ;;  %v3717_v17 = vld [vmem:[#allocation4 + $0x60] sm:$0xff]  }
  0x84   :  { %3385 = vmatpush3.bf16.msra.mxu0 %v3650_v14  ;;  %v3714_v14 = vld [vmem:[#allocation7 + $0xc0] sm:$0xff]  }
  0x85   :  { %3417 = vmatpush3.bf16.msra.mxu1 %v3651_v15  ;;  %3434 = vmatprep.subr.bf16.mxu0 %v3656_v19  ;;  %v3715_v15 = vld [vmem:[#allocation7 + $0x100] sm:$0xff]  }
  0x86   :  { %3466 = vmatprep.subr.bf16.mxu1 %v3657_v20 }
  0x87   :  { %3387 = vmatmul.mubr.bf16.vlgmr.msra.gmra.mxu0 %v3654_v18  ;;  %v3718_v18 = vld [vmem:[#allocation4 + $0x60] sm:$0xff]  }
  0x88   :  { %3419 = vmatmul.mubr.bf16.vlgmr.msra.gmra.mxu1 %v3655_v21  ;;  %3435 = vmatpush3.bf16.msra.mxu0 %v3656_v19  ;;  %v3719_v19 = vld [vmem:[#allocation4 + $0x68] sm:$0xff]   ;;  %v3721_v21 = vld [vmem:[#allocation4 + $0x70] sm:$0xff]  }
  0x89   :  { %3467 = vmatpush3.bf16.msra.mxu1 %v3657_v20  ;;  %3436 = vmatprep.subr.bf16.mxu0 %v3658_v22  ;;  %v3720_v20 = vld [vmem:[#allocation4 + $0x68] sm:$0xff]  }
  0x8a   :  { %3468 = vmatprep.subr.bf16.mxu1 %v3659_v23  ;;  %3390 = vmatprep.mubr.bf16.mxu0 %v3660_v24  ;;  %v3724_v24 = vld [vmem:[#allocation4 + $0x78] sm:$0xff]  }
  0x8b   :  { %3422 = vmatprep.mubr.bf16.mxu1 %v3661_v25  ;;  %v3725_v25 = vld [vmem:[#allocation4 + $0x80] sm:$0xff]  }
  0x8c   :  { %3437 = vmatpush3.bf16.msra.mxu0 %v3658_v22  ;;  %v3722_v22 = vld [vmem:[#allocation4 + $0x70] sm:$0xff]  }
  0x8d   :  { %3469 = vmatpush3.bf16.msra.mxu1 %v3659_v23  ;;  %3438 = vmatprep.subr.bf16.mxu0 %v3664_v27  ;;  %v3723_v23 = vld [vmem:[#allocation4 + $0x78] sm:$0xff]  }
  0x8e   :  { %3470 = vmatprep.subr.bf16.mxu1 %v3665_v28 }
  0x8f   :  { %3391 = vmatmul.mubr.bf16.gmra.mxu0 %v3662_v26  ;;  %v3726_v26 = vld [vmem:[#allocation4 + $0x80] sm:$0xff]  }
  0x90   :  { %3423 = vmatmul.mubr.bf16.gmra.mxu1 %v3663_v29  ;;  %3439 = vmatpush3.bf16.msra.mxu0 %v3664_v27  ;;  %v3727_v27 = vld [vmem:[#allocation4 + $0x88] sm:$0xff]   ;;  %v3729_v29 = vld [vmem:[#allocation4 + $0x90] sm:$0xff]  }
  0x91   :  { %3471 = vmatpush3.bf16.msra.mxu1 %v3665_v28  ;;  %3440 = vmatprep.subr.bf16.mxu0 %v3666_v30  ;;  %v3728_v28 = vld [vmem:[#allocation4 + $0x88] sm:$0xff]  }
  0x92   :  { %3472 = vmatprep.subr.bf16.mxu1 %v3667_v31  ;;  %3394 = vmatprep.mubr.bf16.mxu0 %v3668_v32 }
  0x93   :  { %3426 = vmatprep.mubr.bf16.mxu1 %v3669_v33 }
  0x94   :  { %3441 = vmatpush3.bf16.msra.mxu0 %v3666_v30  ;;  %v3730_v30 = vld [vmem:[#allocation4 + $0x90] sm:$0xff]  }
  0x95   :  { %3473 = vmatpush3.bf16.msra.mxu1 %v3667_v31  ;;  %3442 = vmatprep.subr.bf16.mxu0 %v3672_v35  ;;  %v3731_v31 = vld [vmem:[#allocation4 + $0x98] sm:$0xff]  }
  0x96   :  { %3474 = vmatprep.subr.bf16.mxu1 %v3673_v36 }
  0x97   :  { %3395 = vmatmul.mubr.bf16.gmra.mxu0 %v3670_v34 }
  0x98   :  { %3427 = vmatmul.mubr.bf16.gmra.mxu1 %v3671_v37  ;;  %3443 = vmatpush3.bf16.msra.mxu0 %v3672_v35 }
  0x99   :  { %3475 = vmatpush3.bf16.msra.mxu1 %v3673_v36  ;;  %3444 = vmatprep.subr.bf16.mxu0 %v3674_v38 }
  0x9a   :  { %3476 = vmatprep.subr.bf16.mxu1 %v3675_v39  ;;  %3398 = vmatprep.mubr.bf16.mxu0 %v3676_v40 }
  0x9b   :  { %3430 = vmatprep.mubr.bf16.mxu1 %v3677_v41 }
  0x9c   :  { %3445 = vmatpush3.bf16.msra.mxu0 %v3674_v38 }
  0x9d   :  { %3477 = vmatpush3.bf16.msra.mxu1 %v3675_v39  ;;  %3446 = vmatprep.subr.bf16.mxu0 %v3680_v43 }
  0x9e   :  { %3478 = vmatprep.subr.bf16.mxu1 %v3681_v44 }
  0x9f   :  { %3399 = vmatmul.mubr.bf16.gmra.mxu0 %v3678_v42 }
  0xa0   :  { %3431 = vmatmul.mubr.bf16.gmra.mxu1 %v3679_v45  ;;  %3447 = vmatpush3.bf16.msra.mxu0 %v3680_v43 }
  0xa1   :  { %3479 = vmatpush3.bf16.msra.mxu1 %v3681_v44  ;;  %3448 = vmatprep.subr.bf16.mxu0 %v3682_v46 }
  0xa2   :  { %3480 = vmatprep.subr.bf16.mxu1 %v3683_v47  ;;  %3450 = vmatprep.mubr.bf16.mxu0 %v3684_v48 }
  0xa3   :  { %3482 = vmatprep.mubr.bf16.mxu1 %v3685_v49 }
  0xa4   :  { %3449 = vmatpush3.bf16.msra.mxu0 %v3682_v46 }
  0xa5   :  { %3481 = vmatpush3.bf16.msra.mxu1 %v3683_v47  ;;  %3498 = vmatprep.subr.bf16.mxu0 %v3688_v51 }
  0xa6   :  { %3530 = vmatprep.subr.bf16.mxu1 %v3689_v52 }
  0xa7   :  { %3451 = vmatmul.mubr.bf16.vlgmr.msra.gmra.mxu0 %v3686_v50 }
  0xa8   :  { %3483 = vmatmul.mubr.bf16.vlgmr.msra.gmra.mxu1 %v3687_v53  ;;  %3499 = vmatpush3.bf16.msra.mxu0 %v3688_v51 }
  0xa9   :  { %3531 = vmatpush3.bf16.msra.mxu1 %v3689_v52  ;;  %3500 = vmatprep.subr.bf16.mxu0 %v3690_v54 }
  0xaa   :  { %3532 = vmatprep.subr.bf16.mxu1 %v3691_v55  ;;  %3454 = vmatprep.mubr.bf16.mxu0 %v3692_v56 }
  0xab   :  { %3486 = vmatprep.mubr.bf16.mxu1 %v3693_v57 }
  0xac   :  { %3501 = vmatpush3.bf16.msra.mxu0 %v3690_v54 }
  0xad   :  { %3533 = vmatpush3.bf16.msra.mxu1 %v3691_v55  ;;  %3502 = vmatprep.subr.bf16.mxu0 %v3696_v59 }
  0xae   :  { %3534 = vmatprep.subr.bf16.mxu1 %v3697_v60 }
  0xaf   :  { %3455 = vmatmul.mubr.bf16.gmra.mxu0 %v3694_v58 }
  0xb0   :  { %3487 = vmatmul.mubr.bf16.gmra.mxu1 %v3695_v61  ;;  %3503 = vmatpush3.bf16.msra.mxu0 %v3696_v59 }
  0xb1   :  { %3535 = vmatpush3.bf16.msra.mxu1 %v3697_v60  ;;  %3504 = vmatprep.subr.bf16.mxu0 %v3698_v62 }
  0xb2   :  { %3536 = vmatprep.subr.bf16.mxu1 %v3699_v63  ;;  %3458 = vmatprep.mubr.bf16.mxu0 %v3700_v0 }
  0xb3   :  { %3490 = vmatprep.mubr.bf16.mxu1 %v3701_v1 }
  0xb4   :  { %3505 = vmatpush3.bf16.msra.mxu0 %v3698_v62 }
  0xb5   :  { %3537 = vmatpush3.bf16.msra.mxu1 %v3699_v63  ;;  %3506 = vmatprep.subr.bf16.mxu0 %v3704_v3 }
  0xb6   :  { %3538 = vmatprep.subr.bf16.mxu1 %v3705_v4 }
  0xb7   :  { %3459 = vmatmul.mubr.bf16.gmra.mxu0 %v3702_v2 }
  0xb8   :  { %3491 = vmatmul.mubr.bf16.gmra.mxu1 %v3703_v5  ;;  %3507 = vmatpush3.bf16.msra.mxu0 %v3704_v3 }
  0xb9   :  { %3539 = vmatpush3.bf16.msra.mxu1 %v3705_v4  ;;  %3508 = vmatprep.subr.bf16.mxu0 %v3706_v6 }
  0xba   :  { %3540 = vmatprep.subr.bf16.mxu1 %v3707_v7  ;;  %3462 = vmatprep.mubr.bf16.mxu0 %v3708_v8 }
  0xbb   :  { %3494 = vmatprep.mubr.bf16.mxu1 %v3709_v9 }
  0xbc   :  { %3509 = vmatpush3.bf16.msra.mxu0 %v3706_v6 }
  0xbd   :  { %3541 = vmatpush3.bf16.msra.mxu1 %v3707_v7  ;;  %3510 = vmatprep.subr.bf16.mxu0 %v3712_v11 }
  0xbe   :  { %3542 = vmatprep.subr.bf16.mxu1 %v3713_v12 }
  0xbf   :  { %3463 = vmatmul.mubr.bf16.gmra.mxu0 %v3710_v10 }
  0xc0   :  { %3495 = vmatmul.mubr.bf16.gmra.mxu1 %v3711_v13  ;;  %3511 = vmatpush3.bf16.msra.mxu0 %v3712_v11 }
  0xc1   :  { %3543 = vmatpush3.bf16.msra.mxu1 %v3713_v12  ;;  %3512 = vmatprep.subr.bf16.mxu0 %v3714_v14 }
  0xc2   :  { %3544 = vmatprep.subr.bf16.mxu1 %v3715_v15  ;;  %3514 = vmatprep.mubr.bf16.mxu0 %v3716_v16 }
  0xc3   :  { %3546 = vmatprep.mubr.bf16.mxu1 %v3717_v17 }
  0xc4   :  { %3513 = vmatpush3.bf16.msra.mxu0 %v3714_v14 }
  0xc5   :  { %3545 = vmatpush3.bf16.msra.mxu1 %v3715_v15 }
  0xc7   :  { %3515 = vmatmul.mubr.bf16.vlgmr.msra.gmra.mxu0 %v3718_v18 }
  0xc8   :  { %3547 = vmatmul.mubr.bf16.vlgmr.msra.gmra.mxu1 %v3719_v19  ;;  %3518 = vmatprep.mubr.bf16.mxu0 %v3720_v20 }
  0xc9   :  { %3550 = vmatprep.mubr.bf16.mxu1 %v3721_v21 }
  0xcf   :  { %3519 = vmatmul.mubr.bf16.gmra.mxu0 %v3722_v22 }
  0xd0   :  { %3551 = vmatmul.mubr.bf16.gmra.mxu1 %v3723_v23  ;;  %3522 = vmatprep.mubr.bf16.mxu0 %v3724_v24 }
  0xd1   :  { %3554 = vmatprep.mubr.bf16.mxu1 %v3725_v25 }
  0xd7   :  { %3523 = vmatmul.mubr.bf16.gmra.mxu0 %v3726_v26 }
  0xd8   :  { %3555 = vmatmul.mubr.bf16.gmra.mxu1 %v3727_v27  ;;  %3526 = vmatprep.mubr.bf16.mxu0 %v3728_v28 }
  0xd9   :  { %3558 = vmatprep.mubr.bf16.mxu1 %v3729_v29 }
  0xdf   :  { %3527 = vmatmul.mubr.bf16.gmra.mxu0 %v3730_v30 }
  0xe0   :  { %3559 = vmatmul.mubr.bf16.gmra.mxu1 %v3731_v31 }
 0x107   :  { %v3260_v32 = vpop.f32.mrf.mxu0 }
 0x108   :  { %v3292_v33 = vpop.f32.mrf.mxu1 }
 0x109   :  { %v546_v34 = vadd.f32 %v3292_v33, %v3260_v32  ;;  %v222_v35 = vpop.f32.mrf.mxu0 }
 0x10a   :  { %v465_v36 = vpop.f32.mrf.mxu1 }
 0x10b   :  { %v544_v37 = vadd.f32 %v465_v36, %v222_v35  ;;  %v3261_v38 = vpop.f32.mrf.mxu0 }
 0x10c   :  { %v3293_v39 = vpop.f32.mrf.mxu1 }
 0x10d   :  { %v547_v40 = vadd.f32 %v3293_v39, %v3261_v38  ;;  %v225_v41 = vpop.f32.mrf.mxu0 }
 0x10e   :  { %v468_v42 = vpop.f32.mrf.mxu1 }
 0x10f   :  { %v545_v43 = vadd.f32 %v468_v42, %v225_v41  ;;  %v3264_v44 = vpop.f32.mrf.mxu0 }
 0x110   :  { %v3296_v45 = vpop.f32.mrf.mxu1 }
 0x111   :  { %v550_v46 = vadd.f32 %v3296_v45, %v3264_v44  ;;  %v238_v47 = vpop.f32.mrf.mxu0 }
 0x112   :  { %v481_v48 = vpop.f32.mrf.mxu1 }
 0x113   :  { %v548_v49 = vadd.f32 %v481_v48, %v238_v47  ;;  %v3265_v50 = vpop.f32.mrf.mxu0 }
 0x114   :  { %v3297_v51 = vpop.f32.mrf.mxu1 }
 0x115   :  { %v551_v52 = vadd.f32 %v3297_v51, %v3265_v50  ;;  %v241_v53 = vpop.f32.mrf.mxu0 }
 0x116   :  { %v484_v54 = vpop.f32.mrf.mxu1 }
 0x117   :  { %v549_v55 = vadd.f32 %v484_v54, %v241_v53  ;;  %v3268_v56 = vpop.f32.mrf.mxu0 }
 0x118   :  { %v3300_v57 = vpop.f32.mrf.mxu1 }
 0x119   :  { %v554_v58 = vadd.f32 %v3300_v57, %v3268_v56  ;;  %v254_v59 = vpop.f32.mrf.mxu0 }
 0x11a   :  { %v497_v60 = vpop.f32.mrf.mxu1 }
 0x11b   :  { %v552_v61 = vadd.f32 %v497_v60, %v254_v59  ;;  %v3269_v62 = vpop.f32.mrf.mxu0 }
 0x11c   :  { %v3301_v63 = vpop.f32.mrf.mxu1 }
 0x11d   :  { %v555_v0 = vadd.f32 %v3301_v63, %v3269_v62  ;;  %v257_v1 = vpop.f32.mrf.mxu0 }
 0x11e   :  { %v500_v2 = vpop.f32.mrf.mxu1 }
 0x11f   :  { %v553_v3 = vadd.f32 %v500_v2, %v257_v1  ;;  %v3272_v4 = vpop.f32.mrf.mxu0 }
 0x120   :  { %v3304_v5 = vpop.f32.mrf.mxu1 }
 0x121   :  { %v558_v6 = vadd.f32 %v3304_v5, %v3272_v4  ;;  %v270_v7 = vpop.f32.mrf.mxu0 }
 0x122   :  { %v513_v8 = vpop.f32.mrf.mxu1 }
 0x123   :  { %v556_v9 = vadd.f32 %v513_v8, %v270_v7  ;;  %v3273_v10 = vpop.f32.mrf.mxu0 }
 0x124   :  { %v3305_v11 = vpop.f32.mrf.mxu1 }
 0x125   :  { %v559_v12 = vadd.f32 %v3305_v11, %v3273_v10  ;;  %v273_v13 = vpop.f32.mrf.mxu0 }
 0x126   :  { %v516_v14 = vpop.f32.mrf.mxu1 }
 0x127   :  { %v557_v15 = vadd.f32 %v516_v14, %v273_v13  ;;  %v3324_v16 = vpop.f32.mrf.mxu0 }
 0x128   :  { %v821_v17 = vadd.f32 %v3324_v16, %v546_v34  ;;  %v3356_v18 = vpop.f32.mrf.mxu1 }
 0x129   :  { %v740_v19 = vpop.f32.mrf.mxu0 }
 0x12a   :  { %v1096_v20 = vadd.f32 %v3356_v18, %v821_v17  ;;  %v819_v21 = vadd.f32 %v740_v19, %v544_v37  ;;  %v1015_v22 = vpop.f32.mrf.mxu1 }
 0x12b   :  { %v3325_v23 = vpop.f32.mrf.mxu0 }
 0x12c   :  { %v1094_v24 = vadd.f32 %v1015_v22, %v819_v21  ;;  %v822_v25 = vadd.f32 %v3325_v23, %v547_v40  ;;  %v3357_v26 = vpop.f32.mrf.mxu1 }
 0x12d   :  { %v743_v27 = vpop.f32.mrf.mxu0 }
 0x12e   :  { %v1097_v28 = vadd.f32 %v3357_v26, %v822_v25  ;;  %v820_v29 = vadd.f32 %v743_v27, %v545_v43  ;;  %v1018_v30 = vpop.f32.mrf.mxu1 }
 0x12f   :  { %v3328_v31 = vpop.f32.mrf.mxu0 }
 0x130   :  { %v1095_v32 = vadd.f32 %v1018_v30, %v820_v29  ;;  %v825_v33 = vadd.f32 %v3328_v31, %v550_v46  ;;  %v3360_v35 = vpop.f32.mrf.mxu1 }
 0x131   :  { %v756_v36 = vpop.f32.mrf.mxu0 }
 0x132   :  { %v1100_v38 = vadd.f32 %v3360_v35, %v825_v33  ;;  %v823_v34 = vadd.f32 %v756_v36, %v548_v49  ;;  %v1031_v39 = vpop.f32.mrf.mxu1 }
 0x133   :  { %v3329_v41 = vpop.f32.mrf.mxu0 }
 0x134   :  { %v1098_v42 = vadd.f32 %v1031_v39, %v823_v34  ;;  %v826_v37 = vadd.f32 %v3329_v41, %v551_v52  ;;  %v3361_v44 = vpop.f32.mrf.mxu1 }
 0x135   :  { %v759_v45 = vpop.f32.mrf.mxu0 }
 0x136   :  { %v1101_v47 = vadd.f32 %v3361_v44, %v826_v37  ;;  %v824_v40 = vadd.f32 %v759_v45, %v549_v55  ;;  %v1034_v48 = vpop.f32.mrf.mxu1 }
 0x137   :  { %v3332_v50 = vpop.f32.mrf.mxu0 }
 0x138   :  { %v1099_v51 = vadd.f32 %v1034_v48, %v824_v40  ;;  %v829_v43 = vadd.f32 %v3332_v50, %v554_v58  ;;  %v3364_v53 = vpop.f32.mrf.mxu1 }
 0x139   :  { %v772_v54 = vpop.f32.mrf.mxu0 }
 0x13a   :  { %v1104_v56 = vadd.f32 %v3364_v53, %v829_v43  ;;  %v827_v46 = vadd.f32 %v772_v54, %v552_v61  ;;  %v1047_v57 = vpop.f32.mrf.mxu1 }
 0x13b   :  { %v3333_v59 = vpop.f32.mrf.mxu0 }
 0x13c   :  { %v1102_v60 = vadd.f32 %v1047_v57, %v827_v46  ;;  %v830_v49 = vadd.f32 %v3333_v59, %v555_v0  ;;  %v3365_v62 = vpop.f32.mrf.mxu1 }
 0x13d   :  { %v775_v63 = vpop.f32.mrf.mxu0 }
 0x13e   :  { %v1105_v1 = vadd.f32 %v3365_v62, %v830_v49  ;;  %v828_v52 = vadd.f32 %v775_v63, %v553_v3  ;;  %v1050_v2 = vpop.f32.mrf.mxu1 }
 0x13f   :  { %v3336_v4 = vpop.f32.mrf.mxu0 }
 0x140   :  { %v1103_v5 = vadd.f32 %v1050_v2, %v828_v52  ;;  %v833_v55 = vadd.f32 %v3336_v4, %v558_v6  ;;  %v3368_v7 = vpop.f32.mrf.mxu1 }
 0x141   :  { %v788_v8 = vpop.f32.mrf.mxu0 }
 0x142   :  { %v1108_v10 = vadd.f32 %v3368_v7, %v833_v55  ;;  %v831_v58 = vadd.f32 %v788_v8, %v556_v9  ;;  %v1063_v11 = vpop.f32.mrf.mxu1 }
 0x143   :  { %v3337_v13 = vpop.f32.mrf.mxu0 }
 0x144   :  { %v1106_v14 = vadd.f32 %v1063_v11, %v831_v58  ;;  %v834_v61 = vadd.f32 %v3337_v13, %v559_v12  ;;  %v3369_v16 = vpop.f32.mrf.mxu1 }
 0x145   :  { %v791_v17 = vpop.f32.mrf.mxu0 }
 0x146   :  { %v1109_v18 = vadd.f32 %v3369_v16, %v834_v61  ;;  %v832_v0 = vadd.f32 %v791_v17, %v557_v15  ;;  %v1066_v19 = vpop.f32.mrf.mxu1 }
 0x147   :  { %v3388_v21 = vpop.f32.mrf.mxu0 }
 0x148   :  { %v1107_v22 = vadd.f32 %v1066_v19, %v832_v0  ;;  %v1371_v3 = vadd.f32 %v3388_v21, %v1096_v20  ;;  %v3862_v23 = vpop.f32.mrf.mxu1 }
 0x149   :  { %v1290_v25 = vpop.f32.mrf.mxu0 }
 0x14a   :  { %v1369_v6 = vadd.f32 %v1290_v25, %v1094_v24  ;;  %v3864_v26 = vpop.f32.mrf.mxu1 }
 0x14b   :  { %v3389_v27 = vpop.f32.mrf.mxu0 }
 0x14c   :  { %v1372_v9 = vadd.f32 %v3389_v27, %v1097_v28  ;;  %v3866_v29 = vpop.f32.mrf.mxu1 }
 0x14d   :  { %v1293_v30 = vpop.f32.mrf.mxu0 }
 0x14e   :  { %v1370_v12 = vadd.f32 %v1293_v30, %v1095_v32  ;;  %v3868_v31 = vpop.f32.mrf.mxu1 }
 0x14f   :  { %v3392_v33 = vpop.f32.mrf.mxu0 }
 0x150   :  { %v1375_v15 = vadd.f32 %v3392_v33, %v1100_v38  ;;  %v3870_v35 = vpop.f32.mrf.mxu1 }
 0x151   :  { %v1306_v36 = vpop.f32.mrf.mxu0 }
 0x152   :  { %v1418_v20 = vmax.f32 %v1371_v3, %v1375_v15  ;;  %v1373_v34 = vadd.f32 %v1306_v36, %v1098_v42  ;;  %v3872_v39 = vpop.f32.mrf.mxu1 }
 0x153   :  { %v3393_v24 = vpop.f32.mrf.mxu0 }
 0x154   :  { %v1417_v41 = vmax.f32 %v1369_v6, %v1373_v34  ;;  %v1376_v37 = vadd.f32 %v3393_v24, %v1101_v47  ;;  %v3874_v44 = vpop.f32.mrf.mxu1 }
 0x155   :  { %v1309_v28 = vpop.f32.mrf.mxu0 }
 0x156   :  { %v1425_v45 = vmax.f32 %v1372_v9, %v1376_v37  ;;  %v1374_v40 = vadd.f32 %v1309_v28, %v1099_v51  ;;  %v3876_v32 = vpop.f32.mrf.mxu1 }
 0x157   :  { %v3396_v48 = vpop.f32.mrf.mxu0 }
 0x158   :  { %v1424_v50 = vmax.f32 %v1370_v12, %v1374_v40  ;;  %v1379_v38 = vadd.f32 %v3396_v48, %v1104_v56  ;;  %v3878_v43 = vpop.f32.mrf.mxu1 }
 0x159   :  { %v1322_v53 = vpop.f32.mrf.mxu0 }
 0x15a   :  { %v1420_v54 = vmax.f32 %v1418_v20, %v1379_v38  ;;  %v1377_v42 = vadd.f32 %v1322_v53, %v1102_v60  ;;  %v3880_v46 = vpop.f32.mrf.mxu1 }
 0x15b   :  { %v3397_v57 = vpop.f32.mrf.mxu0 }
 0x15c   :  { %v1419_v59 = vmax.f32 %v1417_v41, %v1377_v42  ;;  %v1380_v47 = vadd.f32 %v3397_v57, %v1105_v1  ;;  %v3882_v49 = vpop.f32.mrf.mxu1 }
 0x15d   :  { %v1325_v62 = vpop.f32.mrf.mxu0 }
 0x15e   :  { %v1427_v63 = vmax.f32 %v1425_v45, %v1380_v47  ;;  %v1378_v51 = vadd.f32 %v1325_v62, %v1103_v5  ;;  %v3884_v52 = vpop.f32.mrf.mxu1 }
 0x15f   :  { %v3400_v2 = vpop.f32.mrf.mxu0 }
 0x160   :  { %v1426_v4 = vmax.f32 %v1424_v50, %v1378_v51  ;;  %v1383_v56 = vadd.f32 %v3400_v2, %v1108_v10  ;;  %v3886_v55 = vpop.f32.mrf.mxu1 }
 0x161   :  { %v1338_v7 = vpop.f32.mrf.mxu0 }
 0x162   :  { %v1422_v8 = vmax.f32 %v1420_v54, %v1383_v56  ;;  %v1381_v60 = vadd.f32 %v1338_v7, %v1106_v14  ;;  %v3888_v58 = vpop.f32.mrf.mxu1 }
 0x163   :  { %v3401_v11 = vpop.f32.mrf.mxu0 }
 0x164   :  { %v1421_v13 = vmax.f32 %v1419_v59, %v1381_v60  ;;  %v1384_v1 = vadd.f32 %v3401_v11, %v1109_v18  ;;  %v3890_v61 = vpop.f32.mrf.mxu1 }
 0x165   :  { %v1341_v16 = vpop.f32.mrf.mxu0 }
 0x166   :  { %v3892_v17 = vmax.f32 %v1421_v13, %v1422_v8  ;;  %v1429_v5 = vmax.f32 %v1427_v63, %v1384_v1  ;;  %v1382_v0 = vadd.f32 %v1341_v16, %v1107_v22  ;;  %v3894_v19 = vpop.f32.mrf.mxu1 }
 0x167   :  { %v3452_v10 = vpop.f32.mrf.mxu0 }
 0x168   :  { %3969 = vst [vmem:[#allocation14_spill] sm:$0xff] %v3892_v17  ;;  %v1428_v21 = vmax.f32 %v1426_v4, %v1382_v0  ;;  %v3484_v3 = vpop.f32.mrf.mxu1  ;;  %v1919_v63 = vadd.f32 %v3452_v10, %v3862_v23 }
 0x169   :  { %v1838_v25 = vpop.f32.mrf.mxu0 }
 0x16a   :  { %v3896_v6 = vmax.f32 %v1428_v21, %v1429_v5  ;;  %v2112_v14 = vpop.f32.mrf.mxu1  ;;  %v1917_v2 = vadd.f32 %v1838_v25, %v3864_v26  ;;  %v2193_v60 = vadd.f32 %v3484_v3, %v1919_v63 }
 0x16b   :  { %v3453_v27 = vpop.f32.mrf.mxu0 }
 0x16c   :  { %3970 = vst [vmem:[#allocation15_spill] sm:$0xff] %v3896_v6  ;;  %v3485_v9 = vpop.f32.mrf.mxu1  ;;  %v1920_v7 = vadd.f32 %v3453_v27, %v3866_v29  ;;  %v2191_v1 = vadd.f32 %v2112_v14, %v1917_v2 }
 0x16d   :  { %v1841_v30 = vpop.f32.mrf.mxu0 }
 0x16e   :  { %v2115_v18 = vpop.f32.mrf.mxu1  ;;  %v1918_v16 = vadd.f32 %v1841_v30, %v3868_v31  ;;  %v2194_v21 = vadd.f32 %v3485_v9, %v1920_v7 }
 0x16f   :  { %v3456_v12 = vpop.f32.mrf.mxu0 }
 0x170   :  { %v3488_v33 = vpop.f32.mrf.mxu1  ;;  %v1923_v11 = vadd.f32 %v3456_v12, %v3870_v35  ;;  %v2192_v27 = vadd.f32 %v2115_v18, %v1918_v16 }
 0x171   :  { %v1854_v15 = vpop.f32.mrf.mxu0 }
 0x172   :  { %v2128_v36 = vpop.f32.mrf.mxu1  ;;  %v1921_v0 = vadd.f32 %v1854_v15, %v3872_v39  ;;  %v2197_v25 = vadd.f32 %v3488_v33, %v1923_v11  ;;  %v3074_v15 = vld [vmem:[#allocation9 + $0x9] ss:$0 sm:$0xff] }
 0x173   :  { %v3457_v20 = vpop.f32.mrf.mxu0 }
 0x174   :  { %v3489_v34 = vpop.f32.mrf.mxu1  ;;  %v1924_v17 = vadd.f32 %v3457_v20, %v3874_v44  ;;  %v2195_v14 = vadd.f32 %v2128_v36, %v1921_v0  ;;  %v3075_v36 = vld [vmem:[#allocation9 + $0xa] ss:$0 sm:$0xff] }
 0x175   :  { %v1857_v22 = vpop.f32.mrf.mxu0 }
 0x176   :  { %v2131_v24 = vpop.f32.mrf.mxu1  ;;  %v1922_v3 = vadd.f32 %v1857_v22, %v3876_v32  ;;  %v2198_v33 = vadd.f32 %v3489_v34, %v1924_v17 }
 0x177   :  { %v3460_v41 = vpop.f32.mrf.mxu0 }
 0x178   :  { %v3898_v37 = vpop.f32.mrf.mxu1  ;;  %v1927_v39 = vadd.f32 %v3460_v41, %v3878_v43 }
 0x179   :  { %v1870_v28 = vpop.f32.mrf.mxu0 }
 0x17a   :  { %v3900_v45 = vpop.f32.mrf.mxu1  ;;  %v1925_v32 = vadd.f32 %v1870_v28, %v3880_v46 }
 0x17b   :  { %v3902_v40 = vpop.f32.mrf.mxu0 }
 0x17c   :  { %v3904_v48 = vpop.f32.mrf.mxu1  ;;  %v1928_v17 = vadd.f32 %v3902_v40, %v3882_v49 }
 0x17d   :  { %v3906_v50 = vpop.f32.mrf.mxu0 }
 0x17e   :  { %v3908_v38 = vpop.f32.mrf.mxu1  ;;  %v2202_v40 = vadd.f32 %v3904_v48, %v1928_v17 }
 0x17f   :  { %v3910_v53 = vpop.f32.mrf.mxu0 }
 0x180   :  { %v3912_v54 = vpop.f32.mrf.mxu1 }
 0x181   :  { %v3914_v42 = vpop.f32.mrf.mxu0 }
 0x182   :  { %v3916_v57 = vpop.f32.mrf.mxu1 }
 0x183   :  { %v3918_v59 = vpop.f32.mrf.mxu0 }
 0x184   :  { %v3920_v47 = vpop.f32.mrf.mxu1 }
 0x185   :  { %v3922_v62 = vpop.f32.mrf.mxu0 }
 0x186   :  { %v3925_v51 = vpop.f32.mrf.mxu1 }
 0x187   :  { %v3516_v4 = vpop.f32.mrf.mxu0 }
 0x188   :  { %v3548_v56 = vpop.f32.mrf.mxu1  ;;  %v2467_v23 = vadd.f32 %v3516_v4, %v2193_v60  ;;  %v3076_v4 = vld [vmem:[#allocation9 + $0xb] ss:$0 sm:$0xff]  ;;  %v2196_v60 = vadd.f32 %v2131_v24, %v1922_v3 }
 0x189   :  { %v2386_v8 = vpop.f32.mrf.mxu0 }
 0x18a   :  { %v2660_v13 = vpop.f32.mrf.mxu1  ;;  %v2465_v6 = vadd.f32 %v2386_v8, %v2191_v1  ;;  %v2741_v63 = vadd.f32 %v3548_v56, %v2467_v23  ;;  %v3073_v8 = vld [vmem:[#allocation9 + $0x8] ss:$0 sm:$0xff] }
 0x18b   :  { %v3517_v5 = vpop.f32.mrf.mxu0 }
 0x18c   :  { %v3549_v10 = vpop.f32.mrf.mxu1  ;;  %v2468_v35 = vadd.f32 %v3517_v5, %v2194_v21  ;;  %v2739_v2 = vadd.f32 %v2660_v13, %v2465_v6  ;;  %v2846_v11 = vadd.f32 %v3074_v15, %v2741_v63  ;;  %v2201_v6 = vadd.f32 %v3898_v37, %v1927_v39 }
 0x18d   :  { %v2389_v26 = vpop.f32.mrf.mxu0  ;;  %v1926_v21 = vadd.f32 %v3906_v50, %v3884_v52 }
 0x18e   :  { %v2663_v29 = vpop.f32.mrf.mxu1  ;;  %v2466_v9 = vadd.f32 %v2389_v26, %v2192_v27  ;;  %v2742_v22 = vadd.f32 %v3549_v10, %v2468_v35  ;;  %v2844_v34 = vadd.f32 %v3073_v8, %v2739_v2  ;;  %v2199_v10 = vadd.f32 %v3900_v45, %v1925_v32  ;;  %v3077_v2 = vld [vmem:[#allocation9 + $0xc] ss:$0 sm:$0xff] }
 0x18f   :  { %v3520_v12 = vpop.f32.mrf.mxu0  ;;  %v2200_v50 = vadd.f32 %v3908_v38, %v1926_v21 }
 0x190   :  { %v2471_v31 = vadd.f32 %v3520_v12, %v2197_v25  ;;  %v3552_v30 = vpop.f32.mrf.mxu1  ;;  %v2740_v13 = vadd.f32 %v2663_v29, %v2466_v9  ;;  %v2847_v26 = vadd.f32 %v3074_v15, %v2742_v22  ;;  %v1931_v29 = vadd.f32 %v3910_v53, %v3886_v55 }
 0x191   :  { %v2402_v7 = vpop.f32.mrf.mxu0  ;;  %v1929_v15 = vadd.f32 %v3914_v42, %v3888_v58  ;;  %v1930_v42 = vadd.f32 %v3922_v62, %v3894_v19 }
 0x192   :  { %v2745_v44 = vadd.f32 %v3552_v30, %v2471_v31  ;;  %v2469_v20 = vadd.f32 %v2402_v7, %v2195_v14  ;;  %v2676_v18 = vpop.f32.mrf.mxu1  ;;  %v2845_v12 = vadd.f32 %v3073_v8, %v2740_v13  ;;  %v3078_v14 = vld [vmem:[#allocation9 + $0xd] ss:$0 sm:$0xff]  ;;  %v2205_v53 = vadd.f32 %v3912_v54, %v1931_v29  ;;  %v3079_v13 = vld [vmem:[#allocation9 + $0xe] ss:$0 sm:$0xff] }
 0x193   :  { %v3521_v56 = vpop.f32.mrf.mxu0  ;;  %v1932_v8 = vadd.f32 %v3918_v59, %v3890_v61  ;;  %v2203_v58 = vadd.f32 %v3916_v57, %v1929_v15  ;;  %v3080_v61 = vld [vmem:[#allocation9 + $0xf] ss:$0 sm:$0xff]  ;;  %v2204_v57 = vadd.f32 %v3925_v51, %v1930_v42  ;;  %v3081_v51 = vld [vmem:[%s3966_s2] ss:$0 sm:$0xff] }
 0x194   :  { %v2850_v1 = vadd.f32 %v3076_v4, %v2745_v44  ;;  %v2743_v16 = vadd.f32 %v2676_v18, %v2469_v20  ;;  %v2472_v43 = vadd.f32 %v3521_v56, %v2198_v33  ;;  %v3553_v41 = vpop.f32.mrf.mxu1 }
 0x195   :  { %v2405_v5 = vpop.f32.mrf.mxu0 }
 0x196   :  { %v2861_v0 = vmax.f32 %v2846_v11, %v2850_v1  ;;  %v2848_v24 = vadd.f32 %v3075_v36, %v2743_v16  ;;  %v2746_v23 = vadd.f32 %v3553_v41, %v2472_v43  ;;  %v2470_v46 = vadd.f32 %v2405_v5, %v2196_v60  ;;  %v2679_v28 = vpop.f32.mrf.mxu1 }
 0x197   :  { %v3524_v25 = vpop.f32.mrf.mxu0  ;;  %v2206_v16 = vadd.f32 %v3920_v47, %v1932_v8 }
 0x198   :  { %v2860_v27 = vmax.f32 %v2844_v34, %v2848_v24  ;;  %v2851_v37 = vadd.f32 %v3076_v4, %v2746_v23  ;;  %v2744_v3 = vadd.f32 %v2679_v28, %v2470_v46  ;;  %v2475_v35 = vadd.f32 %v3524_v25, %v2201_v6  ;;  %v3556_v49 = vpop.f32.mrf.mxu1 }
 0x199   :  { %v2418_v63 = vpop.f32.mrf.mxu0 }
 0x19a   :  { %v2868_v31 = vmax.f32 %v2847_v26, %v2851_v37  ;;  %v2849_v45 = vadd.f32 %v3075_v36, %v2744_v3  ;;  %v2749_v30 = vadd.f32 %v3556_v49, %v2475_v35  ;;  %v2473_v39 = vadd.f32 %v2418_v63, %v2199_v10  ;;  %v2692_v52 = vpop.f32.mrf.mxu1  ;;  %v3971_v49 = vld [vmem:[#allocation14_spill] sm:$0xff] }
 0x19b   :  { %v3525_v9 = vpop.f32.mrf.mxu0 }
 0x19c   :  { %v2867_v4 = vmax.f32 %v2845_v12, %v2849_v45  ;;  %v2854_v48 = vadd.f32 %v3078_v14, %v2749_v30  ;;  %v2747_v7 = vadd.f32 %v2692_v52, %v2473_v39  ;;  %v2476_v33 = vadd.f32 %v3525_v9, %v2202_v40  ;;  %v3557_v55 = vpop.f32.mrf.mxu1 }
 0x19d   :  { %v2421_v44 = vpop.f32.mrf.mxu0 }
 0x19e   :  { %v2863_v20 = vmax.f32 %v2861_v0, %v2854_v48  ;;  %v2852_v18 = vadd.f32 %v3077_v2, %v2747_v7  ;;  %v2750_v60 = vadd.f32 %v3557_v55, %v2476_v33  ;;  %v2474_v38 = vadd.f32 %v2421_v44, %v2200_v50  ;;  %v2695_v32 = vpop.f32.mrf.mxu1 }
 0x19f   :  { %v3528_v22 = vpop.f32.mrf.mxu0 }
 0x1a0   :  { %v2862_v36 = vmax.f32 %v2860_v27, %v2852_v18  ;;  %v2855_v56 = vadd.f32 %v3078_v14, %v2750_v60  ;;  %v2748_v11 = vadd.f32 %v2695_v32, %v2474_v38  ;;  %v2479_v1 = vadd.f32 %v3528_v22, %v2205_v53  ;;  %v3560_v54 = vpop.f32.mrf.mxu1 }
 0x1a1   :  { %v2434_v59 = vpop.f32.mrf.mxu0 }
 0x1a2   :  { %v2870_v43 = vmax.f32 %v2868_v31, %v2855_v56  ;;  %v2853_v41 = vadd.f32 %v3077_v2, %v2748_v11  ;;  %v2753_v6 = vadd.f32 %v3560_v54, %v2479_v1  ;;  %v2477_v17 = vadd.f32 %v2434_v59, %v2203_v58  ;;  %v2708_v34 = vpop.f32.mrf.mxu1  ;;  %v3972_v31 = vld [vmem:[#allocation15_spill] sm:$0xff] }
 0x1a3   :  { %v3529_v5 = vpop.f32.mrf.mxu0 }
 0x1a4   :  { %v2869_v19 = vmax.f32 %v2867_v4, %v2853_v41  ;;  %v2858_v62 = vadd.f32 %v3080_v61, %v2753_v6  ;;  %v2751_v0 = vadd.f32 %v2708_v34, %v2477_v17  ;;  %v2480_v24 = vadd.f32 %v3529_v5, %v2206_v16  ;;  %v3561_v23 = vpop.f32.mrf.mxu1 }
 0x1a5   :  { %v2437_v46 = vpop.f32.mrf.mxu0 }
 0x1a6   :  { %v2856_v28 = vadd.f32 %v3079_v13, %v2751_v0  ;;  %v2754_v10 = vadd.f32 %v3561_v23, %v2480_v24  ;;  %v2478_v47 = vadd.f32 %v2437_v46, %v2204_v57  ;;  %v2711_v21 = vpop.f32.mrf.mxu1  ;;  %v2865_v26 = vmax.f32 %v2863_v20, %v2858_v62 }
 0x1a8   :  { %v2864_v25 = vmax.f32 %v2862_v36, %v2856_v28  ;;  %v2859_v27 = vadd.f32 %v3080_v61, %v2754_v10  ;;  %v2752_v37 = vadd.f32 %v2711_v21, %v2478_v47 }
 0x1aa   :  { %v2866_v3 = vmax.f32 %v2864_v25, %v2865_v26  ;;  %v2857_v35 = vadd.f32 %v3079_v13, %v2752_v37  ;;  %v2872_v29 = vmax.f32 %v2870_v43, %v2859_v27 }
 0x1ac   :  { %v2876_v40 = vmax.f32 %v3971_v49, %v2866_v3  ;;  %v2871_v12 = vmax.f32 %v2869_v19, %v2857_v35 }
 0x1ae   :  { %v2889_v14 = vadd.f32 %v3081_v51, %v2876_v40  ;;  %v2873_v63 = vmax.f32 %v2871_v12, %v2872_v29 }
 0x1b0   :  { %v2877_v45 = vmax.f32 %v3972_v31, %v2873_v63  ;;  %v2891_v30 = vmax.f32 %v2889_v14, 0.0 }
 0x1b2   :  { %v2890_v39 = vadd.f32 %v3081_v51, %v2877_v45  ;;  %2893 = vst [vmem:[#allocation10] sm:$0xff] %v2891_v30 }
 0x1b4   :  { %v2892_v52 = vmax.f32 %v2890_v39, 0.0 }
 0x1b6   :  { %2894 = vst [vmem:[#allocation10 + $0x8] sm:$0xff] %v2892_v52 }
 0x1b7   :  { %3803 = shalt.err (!%p3800_p5)
}
 0x1b8   :  { %s3826_s2 = smov 128   ;;  %s3827_s10 = smov 8  }
 0x1b9   :  { %2906 = dma.vmem_to_hbm [thread:$0]  %s2901_s8, 256, %s3968_s4, [#allocation6], %s3826_s2, %s3826_s2, %s3827_s10  }
 0x1ba   :  { %3816 = dma.done.wait [#allocation6], 256  }
 0x1bb   :  { %3817 = vsyncadd [#allocation6], 4294967040 }
 0x1bc   :  { %2910 = vsyncpa [#allocation5], 1 }
 0x1bd   :  { %2911 = vsyncpa [#allocation8], 1 }
 0x1be   :  { %2912 = vsyncpa [#allocation6], 1 }

</bundles_post_ra>
